<compile_context>
chip_gen: v5e
topology: v5e:2x2
jax: 0.10.0
libtpu: 0.0.40
codegen_flags: <defaults>
</compile_context>

<pallas_src>
import functools
import math

import jax
import jax.numpy as jnp
from jax import lax
from jax.experimental import pallas as pl
from jax.experimental.pallas import tpu as pltpu

_LN_EPS = 1e-6


def _layernorm(x, w, b):
    mu = jnp.mean(x, axis=-1, keepdims=True)
    var = jnp.mean((x - mu) ** 2, axis=-1, keepdims=True)
    return (x - mu) * lax.rsqrt(var + _LN_EPS) * w + b


def _gelu_exact(x):
    # nn.GELU default = exact erf GELU (kept exact to preserve reference numerics).
    # TODO(synk): tanh-approximate GELU would use the EUP slot (wins on v5e) if
    # looser numerics are acceptable.
    return 0.5 * x * (1.0 + lax.erf(x * (1.0 / math.sqrt(2.0))))


def encoder_block_kernel(x_ref,
                         ln1w_ref, ln1b_ref,
                         wq_ref, bq_ref, wk_ref, bk_ref, wv_ref, bv_ref,
                         wo_ref, bo_ref,
                         ln2w_ref, ln2b_ref,
                         w1_ref, b1_ref, w2_ref, b2_ref,
                         out_ref,
                         h_scr, k_scr, v_scr, attn_scr,
                         *, num_heads, seq_real):
    f32, bf16 = jnp.float32, jnp.bfloat16
    S_pad, D = x_ref.shape[1], x_ref.shape[2]
    TQ = out_ref.shape[1]
    hd = D // num_heads
    t = pl.program_id(1)

    # ---- ln_1 + K/V for the full sequence: computed once per batch element ----
    @pl.when(t == 0)
    def _init_kv():
        h_all = _layernorm(x_ref[0].astype(f32), ln1w_ref[...], ln1b_ref[...])
        h_bf = h_all.astype(bf16)
        h_scr[...] = h_bf
        k_scr[...] = (jnp.dot(h_bf, wk_ref[...], preferred_element_type=f32)
                      + bk_ref[...]).astype(bf16)
        v_scr[...] = (jnp.dot(h_bf, wv_ref[...], preferred_element_type=f32)
                      + bv_ref[...]).astype(bf16)

    # ---- query slab for this tile (sliced from the resident full-seq block) ----
    row = pl.multiple_of(t * TQ, TQ)
    x_q = x_ref[0, pl.ds(row, TQ), :].astype(f32)            # (TQ, D) residual input
    h_q_bf = h_scr[pl.ds(row, TQ), :]                        # cached ln_1 output (bf16)

    # Full-width Q projection (1/sqrt(hd) folded into wq/bq in the wrapper).
    q_all = jnp.dot(h_q_bf, wq_ref[...], preferred_element_type=f32) + bq_ref[...]

    # ---- per-head attention: only score + p@v dots per head ----
    # Static Python loop: static lane slices / stores at h*hd offsets.  Each
    # head's values die at the scratch store, keeping register pressure bounded.
    nt_dims = (((1,), (1,)), ((), ()))                       # q @ k^T
    for h in range(num_heads):
        lo, hi = h * hd, (h + 1) * hd
        q_h = q_all[:, lo:hi].astype(bf16)                   # (TQ, hd)
        k_h = k_scr[:, lo:hi]                                # (S_pad, hd) bf16
        v_h = v_scr[:, lo:hi]                                # (S_pad, hd) bf16
        s = lax.dot_general(q_h, k_h, nt_dims, preferred_element_type=f32)
        if seq_real != S_pad:                                # mask padded keys
            col = lax.broadcasted_iota(jnp.int32, s.shape, 1)
            s = jnp.where(col < seq_real, s, -jnp.inf)
        s = s - jnp.max(s, axis=-1, keepdims=True)
        p = jnp.exp(s)
        # approx reciprocal (EUP): attention probs sum to 1 within ~1e-3.
        p = p * pl.reciprocal(jnp.sum(p, axis=-1, keepdims=True), approx=True)
        attn_scr[:, lo:hi] = jnp.dot(p.astype(bf16), v_h,
                                     preferred_element_type=f32)

    # ---- single full-width out-projection over all heads ----
    attn = (jnp.dot(attn_scr[...].astype(bf16), wo_ref[...],
                    preferred_element_type=f32) + bo_ref[...])

    # ---- dropout (eval: identity) + residual ----
    xr = attn + x_q

    # ---- ln_2 + MLP (Linear -> GELU -> Linear) ----
    y = _layernorm(xr, ln2w_ref[...], ln2b_ref[...])
    y = jnp.dot(y.astype(bf16), w1_ref[...], preferred_element_type=f32) + b1_ref[...]
    y = _gelu_exact(y)
    y = jnp.dot(y.astype(bf16), w2_ref[...], preferred_element_type=f32) + b2_ref[...]

    out_ref[0] = (xr + y).astype(out_ref.dtype)


def encoder_block(x, params, num_heads, q_block=256):
    B, S, D = x.shape
    H = num_heads
    assert D % H == 0
    hd = D // H
    M = params["w1"].shape[1]
    scale = 1.0 / math.sqrt(hd)
    bf16, f32 = jnp.bfloat16, jnp.float32

    # Pad the sequence to a sublane-aligned length (padded keys masked in-kernel,
    # padded query rows sliced away after the call).
    S_pad = ((S + 7) // 8) * 8
    x_in = x if S_pad == S else jnp.pad(x, ((0, 0), (0, S_pad - S), (0, 0)))
    TQ = q_block if (S_pad % q_block == 0 and S_pad > q_block) else S_pad
    num_q_tiles = S_pad // TQ

    # ---- weight plumbing (plain JAX, outside the kernel) ----
    w_in = params["w_in"]                                    # (D, 3D), (in, out)
    b_in = params["b_in"].reshape(3 * D)
    wq = (w_in[:, :D] * scale).astype(bf16)                  # scale folded into Wq
    wk = w_in[:, D:2 * D].astype(bf16)
    wv = w_in[:, 2 * D:].astype(bf16)
    bq = (b_in[:D] * scale).reshape(1, D).astype(f32)
    bk = b_in[D:2 * D].reshape(1, D).astype(f32)
    bv = b_in[2 * D:].reshape(1, D).astype(f32)
    wo = params["w_out"].astype(bf16)
    bo = params["b_out"].reshape(1, D).astype(f32)
    w1 = params["w1"].astype(bf16)
    b1 = params["b1"].reshape(1, M).astype(f32)
    w2 = params["w2"].astype(bf16)
    b2 = params["b2"].reshape(1, D).astype(f32)
    ln1w = params["ln1_w"].reshape(1, D).astype(f32)
    ln1b = params["ln1_b"].reshape(1, D).astype(f32)
    ln2w = params["ln2_w"].reshape(1, D).astype(f32)
    ln2b = params["ln2_b"].reshape(1, D).astype(f32)

    param_list = [ln1w, ln1b, wq, bq, wk, bk, wv, bv, wo, bo,
                  ln2w, ln2b, w1, b1, w2, b2]

    # ---- generation-aware VMEM budget (cap at ~75% of physical VMEM) ----
    try:
        vmem_cap = int(getattr(pltpu.get_tpu_info(), "vmem_capacity_bytes",
                               128 << 20))
    except Exception:
        vmem_cap = 128 << 20
    itemsize = x.dtype.itemsize
    param_bytes = sum(int(a.size) * a.dtype.itemsize for a in param_list)
    block_bytes = 2 * S_pad * D * itemsize + 2 * TQ * D * itemsize
    scratch_bytes = 3 * S_pad * D * 2 + TQ * D * 4
    interm_bytes = 4 * (TQ * M + 2 * TQ * S_pad + 4 * TQ * D + S_pad * D)
    want = int(1.25 * (2 * param_bytes + block_bytes + scratch_bytes + interm_bytes))
    vmem_limit = int(min(max(want, 16 << 20), int(0.75 * vmem_cap)))

    kernel = functools.partial(encoder_block_kernel, num_heads=H, seq_real=S)

    def build(weight_buffer_count):
        def const_spec(a):
            nd = a.ndim
            kwargs = {}
            if weight_buffer_count is not None:
                # Loop-invariant weights: single buffer (index_map is constant,
                # so only one DMA is ever issued) -> halves weight VMEM on v7x.
                kwargs["pipeline_mode"] = pl.Buffered(weight_buffer_count)
            return pl.BlockSpec(a.shape, lambda b, t, _nd=nd: (0,) * _nd, **kwargs)

        in_specs = ([pl.BlockSpec((1, S_pad, D), lambda b, t: (b, 0, 0))]
                    + [const_spec(a) for a in param_list])
        return pl.pallas_call(
            kernel,
            out_shape=jax.ShapeDtypeStruct((B, S_pad, D), x.dtype),
            grid=(B, num_q_tiles),
            in_specs=in_specs,
            out_specs=pl.BlockSpec((1, TQ, D), lambda b, t: (b, t, 0)),
            scratch_shapes=[pltpu.VMEM((S_pad, D), bf16),    # ln_1(x) cache
                            pltpu.VMEM((S_pad, D), bf16),    # K cache
                            pltpu.VMEM((S_pad, D), bf16),    # V cache
                            pltpu.VMEM((TQ, D), f32)],       # per-head attn output
            compiler_params=pltpu.CompilerParams(
                dimension_semantics=("parallel", "arbitrary"),
                vmem_limit_bytes=vmem_limit),
        )

    try:
        out = build(1)(x_in, *param_list)
    except Exception:
        # Fallback for jax versions without single-buffered pipeline_mode support.
        out = build(None)(x_in, *param_list)
    return out if S_pad == S else out[:, :S]


def encoder_block_ref(x, params, num_heads):
    """Pure-JAX f32 reference (loose numerical sanity check)."""
    B, S, D = x.shape
    hd = D // num_heads

    def ln(z, w, b):
        mu = jnp.mean(z, -1, keepdims=True)
        var = jnp.mean((z - mu) ** 2, -1, keepdims=True)
        return (z - mu) * lax.rsqrt(var + _LN_EPS) * w[0] + b[0]

    h = ln(x, params["ln1_w"], params["ln1_b"])
    qkv = h @ params["w_in"] + params["b_in"][0]
    q, k, v = jnp.split(qkv, 3, axis=-1)

    def heads(z):
        return z.reshape(B, S, num_heads, hd).transpose(0, 2, 1, 3)

    qh = heads(q) * (1.0 / math.sqrt(hd))
    kh, vh = heads(k), heads(v)
    s = jnp.einsum("bhqd,bhkd->bhqk", qh, kh)
    p = jax.nn.softmax(s, axis=-1)
    o = jnp.einsum("bhqk,bhkd->bhqd", p, vh)
    o = o.transpose(0, 2, 1, 3).reshape(B, S, D)
    attn = o @ params["w_out"] + params["b_out"][0]
    xr = attn + x
    y = ln(xr, params["ln2_w"], params["ln2_b"])
    y = y @ params["w1"] + params["b1"][0]
    y = 0.5 * y * (1.0 + lax.erf(y / math.sqrt(2.0)))
    y = y @ params["w2"] + params["b2"][0]
    return xr + y


def init_params(key, hidden_dim, mlp_dim):
    def xavier(k, fan_in, fan_out):
        limit = math.sqrt(6.0 / (fan_in + fan_out))
        return jax.random.uniform(k, (fan_in, fan_out), jnp.float32, -limit, limit)

    ks = jax.random.split(key, 8)
    D, M = hidden_dim, mlp_dim
    return {
        "ln1_w": jnp.ones((1, D), jnp.float32),
        "ln1_b": jnp.zeros((1, D), jnp.float32),
        "w_in":  xavier(ks[0], D, 3 * D),                    # in_proj (q|k|v), (in,out)
        "b_in":  jnp.zeros((1, 3 * D), jnp.float32),
        "w_out": xavier(ks[1], D, D),                        # out_proj, (in,out)
        "b_out": jnp.zeros((1, D), jnp.float32),
        "ln2_w": jnp.ones((1, D), jnp.float32),
        "ln2_b": jnp.zeros((1, D), jnp.float32),
        "w1":    xavier(ks[2], D, M),
        "b1":    jax.random.normal(ks[3], (1, M), jnp.float32) * 1e-6,
        "w2":    xavier(ks[4], M, D),
        "b2":    jax.random.normal(ks[5], (1, D), jnp.float32) * 1e-6,
    }


if __name__ == "__main__":
    B, S, D, H, MLP = 2, 8, 32, 4, 64
    key = jax.random.PRNGKey(0)
    kx, kp = jax.random.split(key)
    x = jax.random.normal(kx, (B, S, D), jnp.float32)
    params = init_params(kp, D, MLP)

    out = encoder_block(x, params, num_heads=H)
    jax.block_until_ready(out)
    assert out.shape == (B, S, D)
    assert bool(jnp.all(jnp.isfinite(out)))

    ref = encoder_block_ref(x, params, num_heads=H)
    # loose tolerance: kernel uses bf16 MXU operands + approx softmax reciprocal
    assert bool(jnp.allclose(out, ref, rtol=1e-1, atol=1e-1)), \
        float(jnp.max(jnp.abs(out - ref)))

    print("KERNEL_OK")
</pallas_src>

<mosaic_0001>
module attributes {stable_mosaic.version = 11 : i64} {
  func.func @encoder_block_kernel(%arg0: i32, %arg1: i32, %arg2: memref<1x8x32xf32, #tpu.memory_space<vmem>>, %arg3: memref<1x32xf32, #tpu.memory_space<vmem>>, %arg4: memref<1x32xf32, #tpu.memory_space<vmem>>, %arg5: memref<32x32xbf16, #tpu.memory_space<vmem>>, %arg6: memref<1x32xf32, #tpu.memory_space<vmem>>, %arg7: memref<32x32xbf16, #tpu.memory_space<vmem>>, %arg8: memref<1x32xf32, #tpu.memory_space<vmem>>, %arg9: memref<32x32xbf16, #tpu.memory_space<vmem>>, %arg10: memref<1x32xf32, #tpu.memory_space<vmem>>, %arg11: memref<32x32xbf16, #tpu.memory_space<vmem>>, %arg12: memref<1x32xf32, #tpu.memory_space<vmem>>, %arg13: memref<1x32xf32, #tpu.memory_space<vmem>>, %arg14: memref<1x32xf32, #tpu.memory_space<vmem>>, %arg15: memref<32x64xbf16, #tpu.memory_space<vmem>>, %arg16: memref<1x64xf32, #tpu.memory_space<vmem>>, %arg17: memref<64x32xbf16, #tpu.memory_space<vmem>>, %arg18: memref<1x32xf32, #tpu.memory_space<vmem>>, %arg19: memref<1x8x32xf32, #tpu.memory_space<vmem>>, %arg20: memref<8x32xbf16, #tpu.memory_space<vmem>>, %arg21: memref<8x32xbf16, #tpu.memory_space<vmem>>, %arg22: memref<8x32xbf16, #tpu.memory_space<vmem>>, %arg23: memref<8x32xf32, #tpu.memory_space<vmem>>) attributes {dimension_semantics = [#tpu.dimension_semantics<parallel>, #tpu.dimension_semantics<arbitrary>], iteration_bounds = array<i64: 2, 1>, scalar_prefetch = 0 : i64, scratch_operands = 4 : i64, tpu.core_type = #tpu.core_type<tc>, window_params = [{transform_indices = @transform_0, window_bounds = array<i64: 1, 8, 32>}, {pipeline_mode = #tpu.pipeline_mode<synchronous>, transform_indices = @transform_1, window_bounds = array<i64: 1, 32>}, {pipeline_mode = #tpu.pipeline_mode<synchronous>, transform_indices = @transform_2, window_bounds = array<i64: 1, 32>}, {pipeline_mode = #tpu.pipeline_mode<synchronous>, transform_indices = @transform_3, window_bounds = array<i64: 32, 32>}, {pipeline_mode = #tpu.pipeline_mode<synchronous>, transform_indices = @transform_4, window_bounds = array<i64: 1, 32>}, {pipeline_mode = #tpu.pipeline_mode<synchronous>, transform_indices = @transform_5, window_bounds = array<i64: 32, 32>}, {pipeline_mode = #tpu.pipeline_mode<synchronous>, transform_indices = @transform_6, window_bounds = array<i64: 1, 32>}, {pipeline_mode = #tpu.pipeline_mode<synchronous>, transform_indices = @transform_7, window_bounds = array<i64: 32, 32>}, {pipeline_mode = #tpu.pipeline_mode<synchronous>, transform_indices = @transform_8, window_bounds = array<i64: 1, 32>}, {pipeline_mode = #tpu.pipeline_mode<synchronous>, transform_indices = @transform_9, window_bounds = array<i64: 32, 32>}, {pipeline_mode = #tpu.pipeline_mode<synchronous>, transform_indices = @transform_10, window_bounds = array<i64: 1, 32>}, {pipeline_mode = #tpu.pipeline_mode<synchronous>, transform_indices = @transform_11, window_bounds = array<i64: 1, 32>}, {pipeline_mode = #tpu.pipeline_mode<synchronous>, transform_indices = @transform_12, window_bounds = array<i64: 1, 32>}, {pipeline_mode = #tpu.pipeline_mode<synchronous>, transform_indices = @transform_13, window_bounds = array<i64: 32, 64>}, {pipeline_mode = #tpu.pipeline_mode<synchronous>, transform_indices = @transform_14, window_bounds = array<i64: 1, 64>}, {pipeline_mode = #tpu.pipeline_mode<synchronous>, transform_indices = @transform_15, window_bounds = array<i64: 64, 32>}, {pipeline_mode = #tpu.pipeline_mode<synchronous>, transform_indices = @transform_16, window_bounds = array<i64: 1, 32>}, {transform_indices = @transform_17, window_bounds = array<i64: 1, 8, 32>}]} {
    %c0_i32 = arith.constant 0 : i32
    %0 = arith.cmpi eq, %arg1, %c0_i32 : i32
    %1 = arith.extui %0 : i1 to i32
    %c0_i32_0 = arith.constant 0 : i32
    %2 = arith.cmpi ne, %1, %c0_i32_0 : i32
    scf.if %2 {
      %c0_76 = arith.constant 0 : index
      %c0_77 = arith.constant 0 : index
      %c0_78 = arith.constant 0 : index
      %143 = vector.load %arg2[%c0_76, %c0_77, %c0_78] : memref<1x8x32xf32, #tpu.memory_space<vmem>>, vector<1x8x32xf32>
      %144 = vector.shape_cast %143 : vector<1x8x32xf32> to vector<8x32xf32>
      %c0_79 = arith.constant 0 : index
      %c0_80 = arith.constant 0 : index
      %145 = vector.load %arg3[%c0_79, %c0_80] : memref<1x32xf32, #tpu.memory_space<vmem>>, vector<1x32xf32>
      %c0_81 = arith.constant 0 : index
      %c0_82 = arith.constant 0 : index
      %146 = vector.load %arg4[%c0_81, %c0_82] : memref<1x32xf32, #tpu.memory_space<vmem>>, vector<1x32xf32>
      %cst_83 = arith.constant dense<0.000000e+00> : vector<8xf32>
      %147 = vector.multi_reduction <add>, %144, %cst_83 [1] : vector<8x32xf32> to vector<8xf32>
      %148 = vector.shape_cast %147 : vector<8xf32> to vector<8x1xf32>
      %cst_84 = arith.constant 3.200000e+01 : f32
      %149 = vector.broadcast %cst_84 : f32 to vector<8x1xf32>
      %150 = arith.divf %148, %149 : vector<8x1xf32>
      %151 = vector.broadcast %150 : vector<8x1xf32> to vector<8x32xf32>
      %152 = arith.subf %144, %151 : vector<8x32xf32>
      %153 = arith.mulf %152, %152 : vector<8x32xf32>
      %cst_85 = arith.constant dense<0.000000e+00> : vector<8xf32>
      %154 = vector.multi_reduction <add>, %153, %cst_85 [1] : vector<8x32xf32> to vector<8xf32>
      %155 = vector.shape_cast %154 : vector<8xf32> to vector<8x1xf32>
      %cst_86 = arith.constant 3.200000e+01 : f32
      %156 = vector.broadcast %cst_86 : f32 to vector<8x1xf32>
      %157 = arith.divf %155, %156 : vector<8x1xf32>
      %158 = vector.broadcast %150 : vector<8x1xf32> to vector<8x32xf32>
      %159 = arith.subf %144, %158 : vector<8x32xf32>
      %cst_87 = arith.constant 9.99999997E-7 : f32
      %160 = vector.broadcast %cst_87 : f32 to vector<8x1xf32>
      %161 = arith.addf %157, %160 : vector<8x1xf32>
      %162 = math.rsqrt %161 : vector<8x1xf32>
      %163 = vector.broadcast %162 : vector<8x1xf32> to vector<8x32xf32>
      %164 = arith.mulf %159, %163 : vector<8x32xf32>
      %165 = vector.broadcast %145 : vector<1x32xf32> to vector<8x32xf32>
      %166 = arith.mulf %164, %165 : vector<8x32xf32>
      %167 = vector.broadcast %146 : vector<1x32xf32> to vector<8x32xf32>
      %168 = arith.addf %166, %167 : vector<8x32xf32>
      %169 = arith.truncf %168 : vector<8x32xf32> to vector<8x32xbf16>
      %c0_88 = arith.constant 0 : index
      %c0_89 = arith.constant 0 : index
      %170 = vector.load %arg20[%c0_88, %c0_89] : memref<8x32xbf16, #tpu.memory_space<vmem>>, vector<8x32xbf16>
      tpu.vector_store %arg20[%c0_88, %c0_89], %169 {strides = array<i32>} : memref<8x32xbf16, #tpu.memory_space<vmem>>, vector<8x32xbf16>,
      %c0_90 = arith.constant 0 : index
      %c0_91 = arith.constant 0 : index
      %171 = vector.load %arg7[%c0_90, %c0_91] : memref<32x32xbf16, #tpu.memory_space<vmem>>, vector<32x32xbf16>
      %cst_92 = arith.constant dense<0.000000e+00> : vector<8x32xf32>
      %172 = tpu.matmul %169, %171, %cst_92 {dimension_numbers = #tpu.dot_dimension_numbers<[1], [0], [0], [1], [0, 0, 1, 1], [], []>} : vector<8x32xbf16>, vector<32x32xbf16>, vector<8x32xf32> -> vector<8x32xf32>
      %c0_93 = arith.constant 0 : index
      %c0_94 = arith.constant 0 : index
      %173 = vector.load %arg8[%c0_93, %c0_94] : memref<1x32xf32, #tpu.memory_space<vmem>>, vector<1x32xf32>
      %174 = vector.broadcast %173 : vector<1x32xf32> to vector<8x32xf32>
      %175 = arith.addf %172, %174 : vector<8x32xf32>
      %176 = arith.truncf %175 : vector<8x32xf32> to vector<8x32xbf16>
      %c0_95 = arith.constant 0 : index
      %c0_96 = arith.constant 0 : index
      %177 = vector.load %arg21[%c0_95, %c0_96] : memref<8x32xbf16, #tpu.memory_space<vmem>>, vector<8x32xbf16>
      tpu.vector_store %arg21[%c0_95, %c0_96], %176 {strides = array<i32>} : memref<8x32xbf16, #tpu.memory_space<vmem>>, vector<8x32xbf16>,
      %c0_97 = arith.constant 0 : index
      %c0_98 = arith.constant 0 : index
      %178 = vector.load %arg9[%c0_97, %c0_98] : memref<32x32xbf16, #tpu.memory_space<vmem>>, vector<32x32xbf16>
      %cst_99 = arith.constant dense<0.000000e+00> : vector<8x32xf32>
      %179 = tpu.matmul %169, %178, %cst_99 {dimension_numbers = #tpu.dot_dimension_numbers<[1], [0], [0], [1], [0, 0, 1, 1], [], []>} : vector<8x32xbf16>, vector<32x32xbf16>, vector<8x32xf32> -> vector<8x32xf32>
      %c0_100 = arith.constant 0 : index
      %c0_101 = arith.constant 0 : index
      %180 = vector.load %arg10[%c0_100, %c0_101] : memref<1x32xf32, #tpu.memory_space<vmem>>, vector<1x32xf32>
      %181 = vector.broadcast %180 : vector<1x32xf32> to vector<8x32xf32>
      %182 = arith.addf %179, %181 : vector<8x32xf32>
      %183 = arith.truncf %182 : vector<8x32xf32> to vector<8x32xbf16>
      %c0_102 = arith.constant 0 : index
      %c0_103 = arith.constant 0 : index
      %184 = vector.load %arg22[%c0_102, %c0_103] : memref<8x32xbf16, #tpu.memory_space<vmem>>, vector<8x32xbf16>
      tpu.vector_store %arg22[%c0_102, %c0_103], %183 {strides = array<i32>} : memref<8x32xbf16, #tpu.memory_space<vmem>>, vector<8x32xbf16>,
    } else {
    }
    %c8_i32 = arith.constant 8 : i32
    %3 = arith.muli %arg1, %c8_i32 : i32
    %4 = tpu.assume_multiple %3, 8 : i32
    %c0 = arith.constant 0 : index
    %5 = arith.index_cast %4 : i32 to index
    %c0_1 = arith.constant 0 : index
    %6 = vector.load %arg2[%c0, %5, %c0_1] : memref<1x8x32xf32, #tpu.memory_space<vmem>>, vector<1x8x32xf32>
    %7 = vector.shape_cast %6 : vector<1x8x32xf32> to vector<8x32xf32>
    %8 = arith.index_cast %4 : i32 to index
    %c0_2 = arith.constant 0 : index
    %9 = vector.load %arg20[%8, %c0_2] : memref<8x32xbf16, #tpu.memory_space<vmem>>, vector<8x32xbf16>
    %c0_3 = arith.constant 0 : index
    %c0_4 = arith.constant 0 : index
    %10 = vector.load %arg5[%c0_3, %c0_4] : memref<32x32xbf16, #tpu.memory_space<vmem>>, vector<32x32xbf16>
    %cst = arith.constant dense<0.000000e+00> : vector<8x32xf32>
    %11 = tpu.matmul %9, %10, %cst {dimension_numbers = #tpu.dot_dimension_numbers<[1], [0], [0], [1], [0, 0, 1, 1], [], []>} : vector<8x32xbf16>, vector<32x32xbf16>, vector<8x32xf32> -> vector<8x32xf32>
    %c0_5 = arith.constant 0 : index
    %c0_6 = arith.constant 0 : index
    %12 = vector.load %arg6[%c0_5, %c0_6] : memref<1x32xf32, #tpu.memory_space<vmem>>, vector<1x32xf32>
    %13 = vector.broadcast %12 : vector<1x32xf32> to vector<8x32xf32>
    %14 = arith.addf %11, %13 : vector<8x32xf32>
    %15 = vector.extract_strided_slice %14 {offsets = [0, 0], sizes = [8, 8], strides = [1, 1]} : vector<8x32xf32> to vector<8x8xf32>
    %16 = arith.truncf %15 : vector<8x8xf32> to vector<8x8xbf16>
    %c0_7 = arith.constant 0 : index
    %c0_8 = arith.constant 0 : index
    %17 = vector.load %arg21[%c0_7, %c0_8] : memref<8x32xbf16, #tpu.memory_space<vmem>>, vector<8x8xbf16>
    %c0_9 = arith.constant 0 : index
    %c0_10 = arith.constant 0 : index
    %18 = vector.load %arg22[%c0_9, %c0_10] : memref<8x32xbf16, #tpu.memory_space<vmem>>, vector<8x8xbf16>
    %cst_11 = arith.constant dense<0.000000e+00> : vector<8x8xf32>
    %19 = tpu.matmul %16, %17, %cst_11 {dimension_numbers = #tpu.dot_dimension_numbers<[1], [1], [0], [0], [0, 0, 1, 0], [], []>} : vector<8x8xbf16>, vector<8x8xbf16>, vector<8x8xf32> -> vector<8x8xf32>
    %cst_12 = arith.constant dense<0xFF800000> : vector<8xf32>
    %20 = vector.multi_reduction <maximumf>, %19, %cst_12 [1] : vector<8x8xf32> to vector<8xf32>
    %21 = vector.shape_cast %20 : vector<8xf32> to vector<8x1xf32>
    %22 = vector.broadcast %21 : vector<8x1xf32> to vector<8x8xf32>
    %23 = arith.subf %19, %22 : vector<8x8xf32>
    %24 = math.exp %23 : vector<8x8xf32>
    %cst_13 = arith.constant dense<0.000000e+00> : vector<8xf32>
    %25 = vector.multi_reduction <add>, %24, %cst_13 [1] : vector<8x8xf32> to vector<8xf32>
    %26 = vector.shape_cast %25 : vector<8xf32> to vector<8x1xf32>
    %27 = tpu.reciprocal %26 {approx = true} : vector<8x1xf32> -> vector<8x1xf32>
    %28 = vector.broadcast %27 : vector<8x1xf32> to vector<8x8xf32>
    %29 = arith.mulf %24, %28 : vector<8x8xf32>
    %30 = arith.truncf %29 : vector<8x8xf32> to vector<8x8xbf16>
    %cst_14 = arith.constant dense<0.000000e+00> : vector<8x8xf32>
    %31 = tpu.matmul %30, %18, %cst_14 {dimension_numbers = #tpu.dot_dimension_numbers<[1], [0], [0], [1], [0, 0, 1, 1], [], []>} : vector<8x8xbf16>, vector<8x8xbf16>, vector<8x8xf32> -> vector<8x8xf32>
    %c0_15 = arith.constant 0 : index
    %c0_16 = arith.constant 0 : index
    %32 = vector.load %arg23[%c0_15, %c0_16] : memref<8x32xf32, #tpu.memory_space<vmem>>, vector<8x8xf32>
    tpu.vector_store %arg23[%c0_15, %c0_16], %31 {strides = array<i32>} : memref<8x32xf32, #tpu.memory_space<vmem>>, vector<8x8xf32>,
    %33 = vector.extract_strided_slice %14 {offsets = [0, 8], sizes = [8, 8], strides = [1, 1]} : vector<8x32xf32> to vector<8x8xf32>
    %34 = arith.truncf %33 : vector<8x8xf32> to vector<8x8xbf16>
    %c0_17 = arith.constant 0 : index
    %c8 = arith.constant 8 : index
    %35 = vector.load %arg21[%c0_17, %c8] : memref<8x32xbf16, #tpu.memory_space<vmem>>, vector<8x8xbf16>
    %c0_18 = arith.constant 0 : index
    %c8_19 = arith.constant 8 : index
    %36 = vector.load %arg22[%c0_18, %c8_19] : memref<8x32xbf16, #tpu.memory_space<vmem>>, vector<8x8xbf16>
    %cst_20 = arith.constant dense<0.000000e+00> : vector<8x8xf32>
    %37 = tpu.matmul %34, %35, %cst_20 {dimension_numbers = #tpu.dot_dimension_numbers<[1], [1], [0], [0], [0, 0, 1, 0], [], []>} : vector<8x8xbf16>, vector<8x8xbf16>, vector<8x8xf32> -> vector<8x8xf32>
    %cst_21 = arith.constant dense<0xFF800000> : vector<8xf32>
    %38 = vector.multi_reduction <maximumf>, %37, %cst_21 [1] : vector<8x8xf32> to vector<8xf32>
    %39 = vector.shape_cast %38 : vector<8xf32> to vector<8x1xf32>
    %40 = vector.broadcast %39 : vector<8x1xf32> to vector<8x8xf32>
    %41 = arith.subf %37, %40 : vector<8x8xf32>
    %42 = math.exp %41 : vector<8x8xf32>
    %cst_22 = arith.constant dense<0.000000e+00> : vector<8xf32>
    %43 = vector.multi_reduction <add>, %42, %cst_22 [1] : vector<8x8xf32> to vector<8xf32>
    %44 = vector.shape_cast %43 : vector<8xf32> to vector<8x1xf32>
    %45 = tpu.reciprocal %44 {approx = true} : vector<8x1xf32> -> vector<8x1xf32>
    %46 = vector.broadcast %45 : vector<8x1xf32> to vector<8x8xf32>
    %47 = arith.mulf %42, %46 : vector<8x8xf32>
    %48 = arith.truncf %47 : vector<8x8xf32> to vector<8x8xbf16>
    %cst_23 = arith.constant dense<0.000000e+00> : vector<8x8xf32>
    %49 = tpu.matmul %48, %36, %cst_23 {dimension_numbers = #tpu.dot_dimension_numbers<[1], [0], [0], [1], [0, 0, 1, 1], [], []>} : vector<8x8xbf16>, vector<8x8xbf16>, vector<8x8xf32> -> vector<8x8xf32>
    %c0_24 = arith.constant 0 : index
    %c8_25 = arith.constant 8 : index
    %50 = vector.load %arg23[%c0_24, %c8_25] : memref<8x32xf32, #tpu.memory_space<vmem>>, vector<8x8xf32>
    tpu.vector_store %arg23[%c0_24, %c8_25], %49 {strides = array<i32>} : memref<8x32xf32, #tpu.memory_space<vmem>>, vector<8x8xf32>,
    %51 = vector.extract_strided_slice %14 {offsets = [0, 16], sizes = [8, 8], strides = [1, 1]} : vector<8x32xf32> to vector<8x8xf32>
    %52 = arith.truncf %51 : vector<8x8xf32> to vector<8x8xbf16>
    %c0_26 = arith.constant 0 : index
    %c16 = arith.constant 16 : index
    %53 = vector.load %arg21[%c0_26, %c16] : memref<8x32xbf16, #tpu.memory_space<vmem>>, vector<8x8xbf16>
    %c0_27 = arith.constant 0 : index
    %c16_28 = arith.constant 16 : index
    %54 = vector.load %arg22[%c0_27, %c16_28] : memref<8x32xbf16, #tpu.memory_space<vmem>>, vector<8x8xbf16>
    %cst_29 = arith.constant dense<0.000000e+00> : vector<8x8xf32>
    %55 = tpu.matmul %52, %53, %cst_29 {dimension_numbers = #tpu.dot_dimension_numbers<[1], [1], [0], [0], [0, 0, 1, 0], [], []>} : vector<8x8xbf16>, vector<8x8xbf16>, vector<8x8xf32> -> vector<8x8xf32>
    %cst_30 = arith.constant dense<0xFF800000> : vector<8xf32>
    %56 = vector.multi_reduction <maximumf>, %55, %cst_30 [1] : vector<8x8xf32> to vector<8xf32>
    %57 = vector.shape_cast %56 : vector<8xf32> to vector<8x1xf32>
    %58 = vector.broadcast %57 : vector<8x1xf32> to vector<8x8xf32>
    %59 = arith.subf %55, %58 : vector<8x8xf32>
    %60 = math.exp %59 : vector<8x8xf32>
    %cst_31 = arith.constant dense<0.000000e+00> : vector<8xf32>
    %61 = vector.multi_reduction <add>, %60, %cst_31 [1] : vector<8x8xf32> to vector<8xf32>
    %62 = vector.shape_cast %61 : vector<8xf32> to vector<8x1xf32>
    %63 = tpu.reciprocal %62 {approx = true} : vector<8x1xf32> -> vector<8x1xf32>
    %64 = vector.broadcast %63 : vector<8x1xf32> to vector<8x8xf32>
    %65 = arith.mulf %60, %64 : vector<8x8xf32>
    %66 = arith.truncf %65 : vector<8x8xf32> to vector<8x8xbf16>
    %cst_32 = arith.constant dense<0.000000e+00> : vector<8x8xf32>
    %67 = tpu.matmul %66, %54, %cst_32 {dimension_numbers = #tpu.dot_dimension_numbers<[1], [0], [0], [1], [0, 0, 1, 1], [], []>} : vector<8x8xbf16>, vector<8x8xbf16>, vector<8x8xf32> -> vector<8x8xf32>
    %c0_33 = arith.constant 0 : index
    %c16_34 = arith.constant 16 : index
    %68 = vector.load %arg23[%c0_33, %c16_34] : memref<8x32xf32, #tpu.memory_space<vmem>>, vector<8x8xf32>
    tpu.vector_store %arg23[%c0_33, %c16_34], %67 {strides = array<i32>} : memref<8x32xf32, #tpu.memory_space<vmem>>, vector<8x8xf32>,
    %69 = vector.extract_strided_slice %14 {offsets = [0, 24], sizes = [8, 8], strides = [1, 1]} : vector<8x32xf32> to vector<8x8xf32>
    %70 = arith.truncf %69 : vector<8x8xf32> to vector<8x8xbf16>
    %c0_35 = arith.constant 0 : index
    %c24 = arith.constant 24 : index
    %71 = vector.load %arg21[%c0_35, %c24] : memref<8x32xbf16, #tpu.memory_space<vmem>>, vector<8x8xbf16>
    %c0_36 = arith.constant 0 : index
    %c24_37 = arith.constant 24 : index
    %72 = vector.load %arg22[%c0_36, %c24_37] : memref<8x32xbf16, #tpu.memory_space<vmem>>, vector<8x8xbf16>
    %cst_38 = arith.constant dense<0.000000e+00> : vector<8x8xf32>
    %73 = tpu.matmul %70, %71, %cst_38 {dimension_numbers = #tpu.dot_dimension_numbers<[1], [1], [0], [0], [0, 0, 1, 0], [], []>} : vector<8x8xbf16>, vector<8x8xbf16>, vector<8x8xf32> -> vector<8x8xf32>
    %cst_39 = arith.constant dense<0xFF800000> : vector<8xf32>
    %74 = vector.multi_reduction <maximumf>, %73, %cst_39 [1] : vector<8x8xf32> to vector<8xf32>
    %75 = vector.shape_cast %74 : vector<8xf32> to vector<8x1xf32>
    %76 = vector.broadcast %75 : vector<8x1xf32> to vector<8x8xf32>
    %77 = arith.subf %73, %76 : vector<8x8xf32>
    %78 = math.exp %77 : vector<8x8xf32>
    %cst_40 = arith.constant dense<0.000000e+00> : vector<8xf32>
    %79 = vector.multi_reduction <add>, %78, %cst_40 [1] : vector<8x8xf32> to vector<8xf32>
    %80 = vector.shape_cast %79 : vector<8xf32> to vector<8x1xf32>
    %81 = tpu.reciprocal %80 {approx = true} : vector<8x1xf32> -> vector<8x1xf32>
    %82 = vector.broadcast %81 : vector<8x1xf32> to vector<8x8xf32>
    %83 = arith.mulf %78, %82 : vector<8x8xf32>
    %84 = arith.truncf %83 : vector<8x8xf32> to vector<8x8xbf16>
    %cst_41 = arith.constant dense<0.000000e+00> : vector<8x8xf32>
    %85 = tpu.matmul %84, %72, %cst_41 {dimension_numbers = #tpu.dot_dimension_numbers<[1], [0], [0], [1], [0, 0, 1, 1], [], []>} : vector<8x8xbf16>, vector<8x8xbf16>, vector<8x8xf32> -> vector<8x8xf32>
    %c0_42 = arith.constant 0 : index
    %c24_43 = arith.constant 24 : index
    %86 = vector.load %arg23[%c0_42, %c24_43] : memref<8x32xf32, #tpu.memory_space<vmem>>, vector<8x8xf32>
    tpu.vector_store %arg23[%c0_42, %c24_43], %85 {strides = array<i32>} : memref<8x32xf32, #tpu.memory_space<vmem>>, vector<8x8xf32>,
    %c0_44 = arith.constant 0 : index
    %c0_45 = arith.constant 0 : index
    %87 = vector.load %arg23[%c0_44, %c0_45] : memref<8x32xf32, #tpu.memory_space<vmem>>, vector<8x32xf32>
    %88 = arith.truncf %87 : vector<8x32xf32> to vector<8x32xbf16>
    %c0_46 = arith.constant 0 : index
    %c0_47 = arith.constant 0 : index
    %89 = vector.load %arg11[%c0_46, %c0_47] : memref<32x32xbf16, #tpu.memory_space<vmem>>, vector<32x32xbf16>
    %cst_48 = arith.constant dense<0.000000e+00> : vector<8x32xf32>
    %90 = tpu.matmul %88, %89, %cst_48 {dimension_numbers = #tpu.dot_dimension_numbers<[1], [0], [0], [1], [0, 0, 1, 1], [], []>} : vector<8x32xbf16>, vector<32x32xbf16>, vector<8x32xf32> -> vector<8x32xf32>
    %c0_49 = arith.constant 0 : index
    %c0_50 = arith.constant 0 : index
    %91 = vector.load %arg12[%c0_49, %c0_50] : memref<1x32xf32, #tpu.memory_space<vmem>>, vector<1x32xf32>
    %92 = vector.broadcast %91 : vector<1x32xf32> to vector<8x32xf32>
    %93 = arith.addf %90, %92 : vector<8x32xf32>
    %94 = arith.addf %93, %7 : vector<8x32xf32>
    %c0_51 = arith.constant 0 : index
    %c0_52 = arith.constant 0 : index
    %95 = vector.load %arg13[%c0_51, %c0_52] : memref<1x32xf32, #tpu.memory_space<vmem>>, vector<1x32xf32>
    %c0_53 = arith.constant 0 : index
    %c0_54 = arith.constant 0 : index
    %96 = vector.load %arg14[%c0_53, %c0_54] : memref<1x32xf32, #tpu.memory_space<vmem>>, vector<1x32xf32>
    %cst_55 = arith.constant dense<0.000000e+00> : vector<8xf32>
    %97 = vector.multi_reduction <add>, %94, %cst_55 [1] : vector<8x32xf32> to vector<8xf32>
    %98 = vector.shape_cast %97 : vector<8xf32> to vector<8x1xf32>
    %cst_56 = arith.constant 3.200000e+01 : f32
    %99 = vector.broadcast %cst_56 : f32 to vector<8x1xf32>
    %100 = arith.divf %98, %99 : vector<8x1xf32>
    %101 = vector.broadcast %100 : vector<8x1xf32> to vector<8x32xf32>
    %102 = arith.subf %94, %101 : vector<8x32xf32>
    %103 = arith.mulf %102, %102 : vector<8x32xf32>
    %cst_57 = arith.constant dense<0.000000e+00> : vector<8xf32>
    %104 = vector.multi_reduction <add>, %103, %cst_57 [1] : vector<8x32xf32> to vector<8xf32>
    %105 = vector.shape_cast %104 : vector<8xf32> to vector<8x1xf32>
    %cst_58 = arith.constant 3.200000e+01 : f32
    %106 = vector.broadcast %cst_58 : f32 to vector<8x1xf32>
    %107 = arith.divf %105, %106 : vector<8x1xf32>
    %108 = vector.broadcast %100 : vector<8x1xf32> to vector<8x32xf32>
    %109 = arith.subf %94, %108 : vector<8x32xf32>
    %cst_59 = arith.constant 9.99999997E-7 : f32
    %110 = vector.broadcast %cst_59 : f32 to vector<8x1xf32>
    %111 = arith.addf %107, %110 : vector<8x1xf32>
    %112 = math.rsqrt %111 : vector<8x1xf32>
    %113 = vector.broadcast %112 : vector<8x1xf32> to vector<8x32xf32>
    %114 = arith.mulf %109, %113 : vector<8x32xf32>
    %115 = vector.broadcast %95 : vector<1x32xf32> to vector<8x32xf32>
    %116 = arith.mulf %114, %115 : vector<8x32xf32>
    %117 = vector.broadcast %96 : vector<1x32xf32> to vector<8x32xf32>
    %118 = arith.addf %116, %117 : vector<8x32xf32>
    %119 = arith.truncf %118 : vector<8x32xf32> to vector<8x32xbf16>
    %c0_60 = arith.constant 0 : index
    %c0_61 = arith.constant 0 : index
    %120 = vector.load %arg15[%c0_60, %c0_61] : memref<32x64xbf16, #tpu.memory_space<vmem>>, vector<32x64xbf16>
    %cst_62 = arith.constant dense<0.000000e+00> : vector<8x64xf32>
    %121 = tpu.matmul %119, %120, %cst_62 {dimension_numbers = #tpu.dot_dimension_numbers<[1], [0], [0], [1], [0, 0, 1, 1], [], []>} : vector<8x32xbf16>, vector<32x64xbf16>, vector<8x64xf32> -> vector<8x64xf32>
    %c0_63 = arith.constant 0 : index
    %c0_64 = arith.constant 0 : index
    %122 = vector.load %arg16[%c0_63, %c0_64] : memref<1x64xf32, #tpu.memory_space<vmem>>, vector<1x64xf32>
    %123 = vector.broadcast %122 : vector<1x64xf32> to vector<8x64xf32>
    %124 = arith.addf %121, %123 : vector<8x64xf32>
    %cst_65 = arith.constant 5.000000e-01 : f32
    %125 = vector.broadcast %cst_65 : f32 to vector<8x64xf32>
    %126 = arith.mulf %125, %124 : vector<8x64xf32>
    %cst_66 = arith.constant 0.707106769 : f32
    %127 = vector.broadcast %cst_66 : f32 to vector<8x64xf32>
    %128 = arith.mulf %124, %127 : vector<8x64xf32>
    %129 = math.erf %128 : vector<8x64xf32>
    %cst_67 = arith.constant 1.000000e+00 : f32
    %130 = vector.broadcast %cst_67 : f32 to vector<8x64xf32>
    %131 = arith.addf %130, %129 : vector<8x64xf32>
    %132 = arith.mulf %126, %131 : vector<8x64xf32>
    %133 = arith.truncf %132 : vector<8x64xf32> to vector<8x64xbf16>
    %c0_68 = arith.constant 0 : index
    %c0_69 = arith.constant 0 : index
    %134 = vector.load %arg17[%c0_68, %c0_69] : memref<64x32xbf16, #tpu.memory_space<vmem>>, vector<64x32xbf16>
    %cst_70 = arith.constant dense<0.000000e+00> : vector<8x32xf32>
    %135 = tpu.matmul %133, %134, %cst_70 {dimension_numbers = #tpu.dot_dimension_numbers<[1], [0], [0], [1], [0, 0, 1, 1], [], []>} : vector<8x64xbf16>, vector<64x32xbf16>, vector<8x32xf32> -> vector<8x32xf32>
    %c0_71 = arith.constant 0 : index
    %c0_72 = arith.constant 0 : index
    %136 = vector.load %arg18[%c0_71, %c0_72] : memref<1x32xf32, #tpu.memory_space<vmem>>, vector<1x32xf32>
    %137 = vector.broadcast %136 : vector<1x32xf32> to vector<8x32xf32>
    %138 = arith.addf %135, %137 : vector<8x32xf32>
    %139 = arith.addf %94, %138 : vector<8x32xf32>
    %c0_73 = arith.constant 0 : index
    %c0_74 = arith.constant 0 : index
    %c0_75 = arith.constant 0 : index
    %140 = vector.load %arg19[%c0_73, %c0_74, %c0_75] : memref<1x8x32xf32, #tpu.memory_space<vmem>>, vector<1x8x32xf32>
    %141 = vector.shape_cast %140 : vector<1x8x32xf32> to vector<8x32xf32>
    %142 = vector.shape_cast %139 : vector<8x32xf32> to vector<1x8x32xf32>
    tpu.vector_store %arg19[%c0_73, %c0_74, %c0_75], %142 {strides = array<i32>} : memref<1x8x32xf32, #tpu.memory_space<vmem>>, vector<1x8x32xf32>,
    return
  }
  func.func @transform_0(%arg0: i32, %arg1: i32) -> (i32, i32, i32) {
    %c0_i32 = arith.constant 0 : i32
    %c0_i32_0 = arith.constant 0 : i32
    %c0_i32_1 = arith.constant 0 : i32
    return %arg0, %c0_i32, %c0_i32_0 : i32, i32, i32
  }
  func.func @transform_1(%arg0: i32, %arg1: i32) -> (i32, i32) {
    %c0_i32 = arith.constant 0 : i32
    %c0_i32_0 = arith.constant 0 : i32
    %c0_i32_1 = arith.constant 0 : i32
    return %c0_i32, %c0_i32_0 : i32, i32
  }
  func.func @transform_2(%arg0: i32, %arg1: i32) -> (i32, i32) {
    %c0_i32 = arith.constant 0 : i32
    %c0_i32_0 = arith.constant 0 : i32
    %c0_i32_1 = arith.constant 0 : i32
    return %c0_i32, %c0_i32_0 : i32, i32
  }
  func.func @transform_3(%arg0: i32, %arg1: i32) -> (i32, i32) {
    %c0_i32 = arith.constant 0 : i32
    %c0_i32_0 = arith.constant 0 : i32
    %c0_i32_1 = arith.constant 0 : i32
    return %c0_i32, %c0_i32_0 : i32, i32
  }
  func.func @transform_4(%arg0: i32, %arg1: i32) -> (i32, i32) {
    %c0_i32 = arith.constant 0 : i32
    %c0_i32_0 = arith.constant 0 : i32
    %c0_i32_1 = arith.constant 0 : i32
    return %c0_i32, %c0_i32_0 : i32, i32
  }
  func.func @transform_5(%arg0: i32, %arg1: i32) -> (i32, i32) {
    %c0_i32 = arith.constant 0 : i32
    %c0_i32_0 = arith.constant 0 : i32
    %c0_i32_1 = arith.constant 0 : i32
    return %c0_i32, %c0_i32_0 : i32, i32
  }
  func.func @transform_6(%arg0: i32, %arg1: i32) -> (i32, i32) {
    %c0_i32 = arith.constant 0 : i32
    %c0_i32_0 = arith.constant 0 : i32
    %c0_i32_1 = arith.constant 0 : i32
    return %c0_i32, %c0_i32_0 : i32, i32
  }
  func.func @transform_7(%arg0: i32, %arg1: i32) -> (i32, i32) {
    %c0_i32 = arith.constant 0 : i32
    %c0_i32_0 = arith.constant 0 : i32
    %c0_i32_1 = arith.constant 0 : i32
    return %c0_i32, %c0_i32_0 : i32, i32
  }
  func.func @transform_8(%arg0: i32, %arg1: i32) -> (i32, i32) {
    %c0_i32 = arith.constant 0 : i32
    %c0_i32_0 = arith.constant 0 : i32
    %c0_i32_1 = arith.constant 0 : i32
    return %c0_i32, %c0_i32_0 : i32, i32
  }
  func.func @transform_9(%arg0: i32, %arg1: i32) -> (i32, i32) {
    %c0_i32 = arith.constant 0 : i32
    %c0_i32_0 = arith.constant 0 : i32
    %c0_i32_1 = arith.constant 0 : i32
    return %c0_i32, %c0_i32_0 : i32, i32
  }
  func.func @transform_10(%arg0: i32, %arg1: i32) -> (i32, i32) {
    %c0_i32 = arith.constant 0 : i32
    %c0_i32_0 = arith.constant 0 : i32
    %c0_i32_1 = arith.constant 0 : i32
    return %c0_i32, %c0_i32_0 : i32, i32
  }
  func.func @transform_11(%arg0: i32, %arg1: i32) -> (i32, i32) {
    %c0_i32 = arith.constant 0 : i32
    %c0_i32_0 = arith.constant 0 : i32
    %c0_i32_1 = arith.constant 0 : i32
    return %c0_i32, %c0_i32_0 : i32, i32
  }
  func.func @transform_12(%arg0: i32, %arg1: i32) -> (i32, i32) {
    %c0_i32 = arith.constant 0 : i32
    %c0_i32_0 = arith.constant 0 : i32
    %c0_i32_1 = arith.constant 0 : i32
    return %c0_i32, %c0_i32_0 : i32, i32
  }
  func.func @transform_13(%arg0: i32, %arg1: i32) -> (i32, i32) {
    %c0_i32 = arith.constant 0 : i32
    %c0_i32_0 = arith.constant 0 : i32
    %c0_i32_1 = arith.constant 0 : i32
    return %c0_i32, %c0_i32_0 : i32, i32
  }
  func.func @transform_14(%arg0: i32, %arg1: i32) -> (i32, i32) {
    %c0_i32 = arith.constant 0 : i32
    %c0_i32_0 = arith.constant 0 : i32
    %c0_i32_1 = arith.constant 0 : i32
    return %c0_i32, %c0_i32_0 : i32, i32
  }
  func.func @transform_15(%arg0: i32, %arg1: i32) -> (i32, i32) {
    %c0_i32 = arith.constant 0 : i32
    %c0_i32_0 = arith.constant 0 : i32
    %c0_i32_1 = arith.constant 0 : i32
    return %c0_i32, %c0_i32_0 : i32, i32
  }
  func.func @transform_16(%arg0: i32, %arg1: i32) -> (i32, i32) {
    %c0_i32 = arith.constant 0 : i32
    %c0_i32_0 = arith.constant 0 : i32
    %c0_i32_1 = arith.constant 0 : i32
    return %c0_i32, %c0_i32_0 : i32, i32
  }
  func.func @transform_17(%arg0: i32, %arg1: i32) -> (i32, i32, i32) {
    %c0_i32 = arith.constant 0 : i32
    %c0_i32_0 = arith.constant 0 : i32
    return %arg0, %arg1, %c0_i32 : i32, i32, i32
  }
}

module attributes {stable_mosaic.version = 11 : i64} {
  func.func @encoder_block_kernel(%arg0: i32, %arg1: i32, %arg2: memref<1x8x32xf32, #tpu.memory_space<vmem>>, %arg3: memref<1x32xf32, #tpu.memory_space<vmem>>, %arg4: memref<1x32xf32, #tpu.memory_space<vmem>>, %arg5: memref<32x32xbf16, #tpu.memory_space<vmem>>, %arg6: memref<1x32xf32, #tpu.memory_space<vmem>>, %arg7: memref<32x32xbf16, #tpu.memory_space<vmem>>, %arg8: memref<1x32xf32, #tpu.memory_space<vmem>>, %arg9: memref<32x32xbf16, #tpu.memory_space<vmem>>, %arg10: memref<1x32xf32, #tpu.memory_space<vmem>>, %arg11: memref<32x32xbf16, #tpu.memory_space<vmem>>, %arg12: memref<1x32xf32, #tpu.memory_space<vmem>>, %arg13: memref<1x32xf32, #tpu.memory_space<vmem>>, %arg14: memref<1x32xf32, #tpu.memory_space<vmem>>, %arg15: memref<32x64xbf16, #tpu.memory_space<vmem>>, %arg16: memref<1x64xf32, #tpu.memory_space<vmem>>, %arg17: memref<64x32xbf16, #tpu.memory_space<vmem>>, %arg18: memref<1x32xf32, #tpu.memory_space<vmem>>, %arg19: memref<1x8x32xf32, #tpu.memory_space<vmem>>, %arg20: memref<8x32xbf16, #tpu.memory_space<vmem>>, %arg21: memref<8x32xbf16, #tpu.memory_space<vmem>>, %arg22: memref<8x32xbf16, #tpu.memory_space<vmem>>, %arg23: memref<8x32xf32, #tpu.memory_space<vmem>>) attributes {dimension_semantics = [#tpu.dimension_semantics<parallel>, #tpu.dimension_semantics<arbitrary>], iteration_bounds = array<i64: 2, 1>, scalar_prefetch = 0 : i64, scratch_operands = 4 : i64, tpu.core_type = #tpu.core_type<tc>, window_params = [{transform_indices = @transform_0, window_bounds = array<i64: 1, 8, 32>}, {pipeline_mode = #tpu.pipeline_mode<synchronous>, transform_indices = @transform_1, window_bounds = array<i64: 1, 32>}, {pipeline_mode = #tpu.pipeline_mode<synchronous>, transform_indices = @transform_2, window_bounds = array<i64: 1, 32>}, {pipeline_mode = #tpu.pipeline_mode<synchronous>, transform_indices = @transform_3, window_bounds = array<i64: 32, 32>}, {pipeline_mode = #tpu.pipeline_mode<synchronous>, transform_indices = @transform_4, window_bounds = array<i64: 1, 32>}, {pipeline_mode = #tpu.pipeline_mode<synchronous>, transform_indices = @transform_5, window_bounds = array<i64: 32, 32>}, {pipeline_mode = #tpu.pipeline_mode<synchronous>, transform_indices = @transform_6, window_bounds = array<i64: 1, 32>}, {pipeline_mode = #tpu.pipeline_mode<synchronous>, transform_indices = @transform_7, window_bounds = array<i64: 32, 32>}, {pipeline_mode = #tpu.pipeline_mode<synchronous>, transform_indices = @transform_8, window_bounds = array<i64: 1, 32>}, {pipeline_mode = #tpu.pipeline_mode<synchronous>, transform_indices = @transform_9, window_bounds = array<i64: 32, 32>}, {pipeline_mode = #tpu.pipeline_mode<synchronous>, transform_indices = @transform_10, window_bounds = array<i64: 1, 32>}, {pipeline_mode = #tpu.pipeline_mode<synchronous>, transform_indices = @transform_11, window_bounds = array<i64: 1, 32>}, {pipeline_mode = #tpu.pipeline_mode<synchronous>, transform_indices = @transform_12, window_bounds = array<i64: 1, 32>}, {pipeline_mode = #tpu.pipeline_mode<synchronous>, transform_indices = @transform_13, window_bounds = array<i64: 32, 64>}, {pipeline_mode = #tpu.pipeline_mode<synchronous>, transform_indices = @transform_14, window_bounds = array<i64: 1, 64>}, {pipeline_mode = #tpu.pipeline_mode<synchronous>, transform_indices = @transform_15, window_bounds = array<i64: 64, 32>}, {pipeline_mode = #tpu.pipeline_mode<synchronous>, transform_indices = @transform_16, window_bounds = array<i64: 1, 32>}, {transform_indices = @transform_17, window_bounds = array<i64: 1, 8, 32>}]} {
    %c0_i32 = arith.constant 0 : i32
    %0 = arith.cmpi eq, %arg1, %c0_i32 : i32
    %1 = arith.extui %0 : i1 to i32
    %c0_i32_0 = arith.constant 0 : i32
    %2 = arith.cmpi ne, %1, %c0_i32_0 : i32
    scf.if %2 {
      %c0_76 = arith.constant 0 : index
      %c0_77 = arith.constant 0 : index
      %c0_78 = arith.constant 0 : index
      %143 = vector.load %arg2[%c0_76, %c0_77, %c0_78] : memref<1x8x32xf32, #tpu.memory_space<vmem>>, vector<1x8x32xf32>
      %144 = vector.shape_cast %143 : vector<1x8x32xf32> to vector<8x32xf32>
      %c0_79 = arith.constant 0 : index
      %c0_80 = arith.constant 0 : index
      %145 = vector.load %arg3[%c0_79, %c0_80] : memref<1x32xf32, #tpu.memory_space<vmem>>, vector<1x32xf32>
      %c0_81 = arith.constant 0 : index
      %c0_82 = arith.constant 0 : index
      %146 = vector.load %arg4[%c0_81, %c0_82] : memref<1x32xf32, #tpu.memory_space<vmem>>, vector<1x32xf32>
      %cst_83 = arith.constant dense<0.000000e+00> : vector<8xf32>
      %147 = vector.multi_reduction <add>, %144, %cst_83 [1] : vector<8x32xf32> to vector<8xf32>
      %148 = vector.shape_cast %147 : vector<8xf32> to vector<8x1xf32>
      %cst_84 = arith.constant 3.200000e+01 : f32
      %149 = vector.broadcast %cst_84 : f32 to vector<8x1xf32>
      %150 = arith.divf %148, %149 : vector<8x1xf32>
      %151 = vector.broadcast %150 : vector<8x1xf32> to vector<8x32xf32>
      %152 = arith.subf %144, %151 : vector<8x32xf32>
      %153 = arith.mulf %152, %152 : vector<8x32xf32>
      %cst_85 = arith.constant dense<0.000000e+00> : vector<8xf32>
      %154 = vector.multi_reduction <add>, %153, %cst_85 [1] : vector<8x32xf32> to vector<8xf32>
      %155 = vector.shape_cast %154 : vector<8xf32> to vector<8x1xf32>
      %cst_86 = arith.constant 3.200000e+01 : f32
      %156 = vector.broadcast %cst_86 : f32 to vector<8x1xf32>
      %157 = arith.divf %155, %156 : vector<8x1xf32>
      %158 = vector.broadcast %150 : vector<8x1xf32> to vector<8x32xf32>
      %159 = arith.subf %144, %158 : vector<8x32xf32>
      %cst_87 = arith.constant 9.99999997E-7 : f32
      %160 = vector.broadcast %cst_87 : f32 to vector<8x1xf32>
      %161 = arith.addf %157, %160 : vector<8x1xf32>
      %162 = math.rsqrt %161 : vector<8x1xf32>
      %163 = vector.broadcast %162 : vector<8x1xf32> to vector<8x32xf32>
      %164 = arith.mulf %159, %163 : vector<8x32xf32>
      %165 = vector.broadcast %145 : vector<1x32xf32> to vector<8x32xf32>
      %166 = arith.mulf %164, %165 : vector<8x32xf32>
      %167 = vector.broadcast %146 : vector<1x32xf32> to vector<8x32xf32>
      %168 = arith.addf %166, %167 : vector<8x32xf32>
      %169 = arith.truncf %168 : vector<8x32xf32> to vector<8x32xbf16>
      %c0_88 = arith.constant 0 : index
      %c0_89 = arith.constant 0 : index
      %170 = vector.load %arg20[%c0_88, %c0_89] : memref<8x32xbf16, #tpu.memory_space<vmem>>, vector<8x32xbf16>
      tpu.vector_store %arg20[%c0_88, %c0_89], %169 {strides = array<i32>} : memref<8x32xbf16, #tpu.memory_space<vmem>>, vector<8x32xbf16>,
      %c0_90 = arith.constant 0 : index
      %c0_91 = arith.constant 0 : index
      %171 = vector.load %arg7[%c0_90, %c0_91] : memref<32x32xbf16, #tpu.memory_space<vmem>>, vector<32x32xbf16>
      %cst_92 = arith.constant dense<0.000000e+00> : vector<8x32xf32>
      %172 = tpu.matmul %169, %171, %cst_92 {dimension_numbers = #tpu.dot_dimension_numbers<[1], [0], [0], [1], [0, 0, 1, 1], [], []>} : vector<8x32xbf16>, vector<32x32xbf16>, vector<8x32xf32> -> vector<8x32xf32>
      %c0_93 = arith.constant 0 : index
      %c0_94 = arith.constant 0 : index
      %173 = vector.load %arg8[%c0_93, %c0_94] : memref<1x32xf32, #tpu.memory_space<vmem>>, vector<1x32xf32>
      %174 = vector.broadcast %173 : vector<1x32xf32> to vector<8x32xf32>
      %175 = arith.addf %172, %174 : vector<8x32xf32>
      %176 = arith.truncf %175 : vector<8x32xf32> to vector<8x32xbf16>
      %c0_95 = arith.constant 0 : index
      %c0_96 = arith.constant 0 : index
      %177 = vector.load %arg21[%c0_95, %c0_96] : memref<8x32xbf16, #tpu.memory_space<vmem>>, vector<8x32xbf16>
      tpu.vector_store %arg21[%c0_95, %c0_96], %176 {strides = array<i32>} : memref<8x32xbf16, #tpu.memory_space<vmem>>, vector<8x32xbf16>,
      %c0_97 = arith.constant 0 : index
      %c0_98 = arith.constant 0 : index
      %178 = vector.load %arg9[%c0_97, %c0_98] : memref<32x32xbf16, #tpu.memory_space<vmem>>, vector<32x32xbf16>
      %cst_99 = arith.constant dense<0.000000e+00> : vector<8x32xf32>
      %179 = tpu.matmul %169, %178, %cst_99 {dimension_numbers = #tpu.dot_dimension_numbers<[1], [0], [0], [1], [0, 0, 1, 1], [], []>} : vector<8x32xbf16>, vector<32x32xbf16>, vector<8x32xf32> -> vector<8x32xf32>
      %c0_100 = arith.constant 0 : index
      %c0_101 = arith.constant 0 : index
      %180 = vector.load %arg10[%c0_100, %c0_101] : memref<1x32xf32, #tpu.memory_space<vmem>>, vector<1x32xf32>
      %181 = vector.broadcast %180 : vector<1x32xf32> to vector<8x32xf32>
      %182 = arith.addf %179, %181 : vector<8x32xf32>
      %183 = arith.truncf %182 : vector<8x32xf32> to vector<8x32xbf16>
      %c0_102 = arith.constant 0 : index
      %c0_103 = arith.constant 0 : index
      %184 = vector.load %arg22[%c0_102, %c0_103] : memref<8x32xbf16, #tpu.memory_space<vmem>>, vector<8x32xbf16>
      tpu.vector_store %arg22[%c0_102, %c0_103], %183 {strides = array<i32>} : memref<8x32xbf16, #tpu.memory_space<vmem>>, vector<8x32xbf16>,
    } else {
    }
    %c8_i32 = arith.constant 8 : i32
    %3 = arith.muli %arg1, %c8_i32 : i32
    %4 = tpu.assume_multiple %3, 8 : i32
    %c0 = arith.constant 0 : index
    %5 = arith.index_cast %4 : i32 to index
    %c0_1 = arith.constant 0 : index
    %6 = vector.load %arg2[%c0, %5, %c0_1] : memref<1x8x32xf32, #tpu.memory_space<vmem>>, vector<1x8x32xf32>
    %7 = vector.shape_cast %6 : vector<1x8x32xf32> to vector<8x32xf32>
    %8 = arith.index_cast %4 : i32 to index
    %c0_2 = arith.constant 0 : index
    %9 = vector.load %arg20[%8, %c0_2] : memref<8x32xbf16, #tpu.memory_space<vmem>>, vector<8x32xbf16>
    %c0_3 = arith.constant 0 : index
    %c0_4 = arith.constant 0 : index
    %10 = vector.load %arg5[%c0_3, %c0_4] : memref<32x32xbf16, #tpu.memory_space<vmem>>, vector<32x32xbf16>
    %cst = arith.constant dense<0.000000e+00> : vector<8x32xf32>
    %11 = tpu.matmul %9, %10, %cst {dimension_numbers = #tpu.dot_dimension_numbers<[1], [0], [0], [1], [0, 0, 1, 1], [], []>} : vector<8x32xbf16>, vector<32x32xbf16>, vector<8x32xf32> -> vector<8x32xf32>
    %c0_5 = arith.constant 0 : index
    %c0_6 = arith.constant 0 : index
    %12 = vector.load %arg6[%c0_5, %c0_6] : memref<1x32xf32, #tpu.memory_space<vmem>>, vector<1x32xf32>
    %13 = vector.broadcast %12 : vector<1x32xf32> to vector<8x32xf32>
    %14 = arith.addf %11, %13 : vector<8x32xf32>
    %15 = vector.extract_strided_slice %14 {offsets = [0, 0], sizes = [8, 8], strides = [1, 1]} : vector<8x32xf32> to vector<8x8xf32>
    %16 = arith.truncf %15 : vector<8x8xf32> to vector<8x8xbf16>
    %c0_7 = arith.constant 0 : index
    %c0_8 = arith.constant 0 : index
    %17 = vector.load %arg21[%c0_7, %c0_8] : memref<8x32xbf16, #tpu.memory_space<vmem>>, vector<8x8xbf16>
    %c0_9 = arith.constant 0 : index
    %c0_10 = arith.constant 0 : index
    %18 = vector.load %arg22[%c0_9, %c0_10] : memref<8x32xbf16, #tpu.memory_space<vmem>>, vector<8x8xbf16>
    %cst_11 = arith.constant dense<0.000000e+00> : vector<8x8xf32>
    %19 = tpu.matmul %16, %17, %cst_11 {dimension_numbers = #tpu.dot_dimension_numbers<[1], [1], [0], [0], [0, 0, 1, 0], [], []>} : vector<8x8xbf16>, vector<8x8xbf16>, vector<8x8xf32> -> vector<8x8xf32>
    %cst_12 = arith.constant dense<0xFF800000> : vector<8xf32>
    %20 = vector.multi_reduction <maximumf>, %19, %cst_12 [1] : vector<8x8xf32> to vector<8xf32>
    %21 = vector.shape_cast %20 : vector<8xf32> to vector<8x1xf32>
    %22 = vector.broadcast %21 : vector<8x1xf32> to vector<8x8xf32>
    %23 = arith.subf %19, %22 : vector<8x8xf32>
    %24 = math.exp %23 : vector<8x8xf32>
    %cst_13 = arith.constant dense<0.000000e+00> : vector<8xf32>
    %25 = vector.multi_reduction <add>, %24, %cst_13 [1] : vector<8x8xf32> to vector<8xf32>
    %26 = vector.shape_cast %25 : vector<8xf32> to vector<8x1xf32>
    %27 = tpu.reciprocal %26 {approx = true} : vector<8x1xf32> -> vector<8x1xf32>
    %28 = vector.broadcast %27 : vector<8x1xf32> to vector<8x8xf32>
    %29 = arith.mulf %24, %28 : vector<8x8xf32>
    %30 = arith.truncf %29 : vector<8x8xf32> to vector<8x8xbf16>
    %cst_14 = arith.constant dense<0.000000e+00> : vector<8x8xf32>
    %31 = tpu.matmul %30, %18, %cst_14 {dimension_numbers = #tpu.dot_dimension_numbers<[1], [0], [0], [1], [0, 0, 1, 1], [], []>} : vector<8x8xbf16>, vector<8x8xbf16>, vector<8x8xf32> -> vector<8x8xf32>
    %c0_15 = arith.constant 0 : index
    %c0_16 = arith.constant 0 : index
    %32 = vector.load %arg23[%c0_15, %c0_16] : memref<8x32xf32, #tpu.memory_space<vmem>>, vector<8x8xf32>
    tpu.vector_store %arg23[%c0_15, %c0_16], %31 {strides = array<i32>} : memref<8x32xf32, #tpu.memory_space<vmem>>, vector<8x8xf32>,
    %33 = vector.extract_strided_slice %14 {offsets = [0, 8], sizes = [8, 8], strides = [1, 1]} : vector<8x32xf32> to vector<8x8xf32>
    %34 = arith.truncf %33 : vector<8x8xf32> to vector<8x8xbf16>
    %c0_17 = arith.constant 0 : index
    %c8 = arith.constant 8 : index
    %35 = vector.load %arg21[%c0_17, %c8] : memref<8x32xbf16, #tpu.memory_space<vmem>>, vector<8x8xbf16>
    %c0_18 = arith.constant 0 : index
    %c8_19 = arith.constant 8 : index
    %36 = vector.load %arg22[%c0_18, %c8_19] : memref<8x32xbf16, #tpu.memory_space<vmem>>, vector<8x8xbf16>
    %cst_20 = arith.constant dense<0.000000e+00> : vector<8x8xf32>
    %37 = tpu.matmul %34, %35, %cst_20 {dimension_numbers = #tpu.dot_dimension_numbers<[1], [1], [0], [0], [0, 0, 1, 0], [], []>} : vector<8x8xbf16>, vector<8x8xbf16>, vector<8x8xf32> -> vector<8x8xf32>
    %cst_21 = arith.constant dense<0xFF800000> : vector<8xf32>
    %38 = vector.multi_reduction <maximumf>, %37, %cst_21 [1] : vector<8x8xf32> to vector<8xf32>
    %39 = vector.shape_cast %38 : vector<8xf32> to vector<8x1xf32>
    %40 = vector.broadcast %39 : vector<8x1xf32> to vector<8x8xf32>
    %41 = arith.subf %37, %40 : vector<8x8xf32>
    %42 = math.exp %41 : vector<8x8xf32>
    %cst_22 = arith.constant dense<0.000000e+00> : vector<8xf32>
    %43 = vector.multi_reduction <add>, %42, %cst_22 [1] : vector<8x8xf32> to vector<8xf32>
    %44 = vector.shape_cast %43 : vector<8xf32> to vector<8x1xf32>
    %45 = tpu.reciprocal %44 {approx = true} : vector<8x1xf32> -> vector<8x1xf32>
    %46 = vector.broadcast %45 : vector<8x1xf32> to vector<8x8xf32>
    %47 = arith.mulf %42, %46 : vector<8x8xf32>
    %48 = arith.truncf %47 : vector<8x8xf32> to vector<8x8xbf16>
    %cst_23 = arith.constant dense<0.000000e+00> : vector<8x8xf32>
    %49 = tpu.matmul %48, %36, %cst_23 {dimension_numbers = #tpu.dot_dimension_numbers<[1], [0], [0], [1], [0, 0, 1, 1], [], []>} : vector<8x8xbf16>, vector<8x8xbf16>, vector<8x8xf32> -> vector<8x8xf32>
    %c0_24 = arith.constant 0 : index
    %c8_25 = arith.constant 8 : index
    %50 = vector.load %arg23[%c0_24, %c8_25] : memref<8x32xf32, #tpu.memory_space<vmem>>, vector<8x8xf32>
    tpu.vector_store %arg23[%c0_24, %c8_25], %49 {strides = array<i32>} : memref<8x32xf32, #tpu.memory_space<vmem>>, vector<8x8xf32>,
    %51 = vector.extract_strided_slice %14 {offsets = [0, 16], sizes = [8, 8], strides = [1, 1]} : vector<8x32xf32> to vector<8x8xf32>
    %52 = arith.truncf %51 : vector<8x8xf32> to vector<8x8xbf16>
    %c0_26 = arith.constant 0 : index
    %c16 = arith.constant 16 : index
    %53 = vector.load %arg21[%c0_26, %c16] : memref<8x32xbf16, #tpu.memory_space<vmem>>, vector<8x8xbf16>
    %c0_27 = arith.constant 0 : index
    %c16_28 = arith.constant 16 : index
    %54 = vector.load %arg22[%c0_27, %c16_28] : memref<8x32xbf16, #tpu.memory_space<vmem>>, vector<8x8xbf16>
    %cst_29 = arith.constant dense<0.000000e+00> : vector<8x8xf32>
    %55 = tpu.matmul %52, %53, %cst_29 {dimension_numbers = #tpu.dot_dimension_numbers<[1], [1], [0], [0], [0, 0, 1, 0], [], []>} : vector<8x8xbf16>, vector<8x8xbf16>, vector<8x8xf32> -> vector<8x8xf32>
    %cst_30 = arith.constant dense<0xFF800000> : vector<8xf32>
    %56 = vector.multi_reduction <maximumf>, %55, %cst_30 [1] : vector<8x8xf32> to vector<8xf32>
    %57 = vector.shape_cast %56 : vector<8xf32> to vector<8x1xf32>
    %58 = vector.broadcast %57 : vector<8x1xf32> to vector<8x8xf32>
    %59 = arith.subf %55, %58 : vector<8x8xf32>
    %60 = math.exp %59 : vector<8x8xf32>
    %cst_31 = arith.constant dense<0.000000e+00> : vector<8xf32>
    %61 = vector.multi_reduction <add>, %60, %cst_31 [1] : vector<8x8xf32> to vector<8xf32>
    %62 = vector.shape_cast %61 : vector<8xf32> to vector<8x1xf32>
    %63 = tpu.reciprocal %62 {approx = true} : vector<8x1xf32> -> vector<8x1xf32>
    %64 = vector.broadcast %63 : vector<8x1xf32> to vector<8x8xf32>
    %65 = arith.mulf %60, %64 : vector<8x8xf32>
    %66 = arith.truncf %65 : vector<8x8xf32> to vector<8x8xbf16>
    %cst_32 = arith.constant dense<0.000000e+00> : vector<8x8xf32>
    %67 = tpu.matmul %66, %54, %cst_32 {dimension_numbers = #tpu.dot_dimension_numbers<[1], [0], [0], [1], [0, 0, 1, 1], [], []>} : vector<8x8xbf16>, vector<8x8xbf16>, vector<8x8xf32> -> vector<8x8xf32>
    %c0_33 = arith.constant 0 : index
    %c16_34 = arith.constant 16 : index
    %68 = vector.load %arg23[%c0_33, %c16_34] : memref<8x32xf32, #tpu.memory_space<vmem>>, vector<8x8xf32>
    tpu.vector_store %arg23[%c0_33, %c16_34], %67 {strides = array<i32>} : memref<8x32xf32, #tpu.memory_space<vmem>>, vector<8x8xf32>,
    %69 = vector.extract_strided_slice %14 {offsets = [0, 24], sizes = [8, 8], strides = [1, 1]} : vector<8x32xf32> to vector<8x8xf32>
    %70 = arith.truncf %69 : vector<8x8xf32> to vector<8x8xbf16>
    %c0_35 = arith.constant 0 : index
    %c24 = arith.constant 24 : index
    %71 = vector.load %arg21[%c0_35, %c24] : memref<8x32xbf16, #tpu.memory_space<vmem>>, vector<8x8xbf16>
    %c0_36 = arith.constant 0 : index
    %c24_37 = arith.constant 24 : index
    %72 = vector.load %arg22[%c0_36, %c24_37] : memref<8x32xbf16, #tpu.memory_space<vmem>>, vector<8x8xbf16>
    %cst_38 = arith.constant dense<0.000000e+00> : vector<8x8xf32>
    %73 = tpu.matmul %70, %71, %cst_38 {dimension_numbers = #tpu.dot_dimension_numbers<[1], [1], [0], [0], [0, 0, 1, 0], [], []>} : vector<8x8xbf16>, vector<8x8xbf16>, vector<8x8xf32> -> vector<8x8xf32>
    %cst_39 = arith.constant dense<0xFF800000> : vector<8xf32>
    %74 = vector.multi_reduction <maximumf>, %73, %cst_39 [1] : vector<8x8xf32> to vector<8xf32>
    %75 = vector.shape_cast %74 : vector<8xf32> to vector<8x1xf32>
    %76 = vector.broadcast %75 : vector<8x1xf32> to vector<8x8xf32>
    %77 = arith.subf %73, %76 : vector<8x8xf32>
    %78 = math.exp %77 : vector<8x8xf32>
    %cst_40 = arith.constant dense<0.000000e+00> : vector<8xf32>
    %79 = vector.multi_reduction <add>, %78, %cst_40 [1] : vector<8x8xf32> to vector<8xf32>
    %80 = vector.shape_cast %79 : vector<8xf32> to vector<8x1xf32>
    %81 = tpu.reciprocal %80 {approx = true} : vector<8x1xf32> -> vector<8x1xf32>
    %82 = vector.broadcast %81 : vector<8x1xf32> to vector<8x8xf32>
    %83 = arith.mulf %78, %82 : vector<8x8xf32>
    %84 = arith.truncf %83 : vector<8x8xf32> to vector<8x8xbf16>
    %cst_41 = arith.constant dense<0.000000e+00> : vector<8x8xf32>
    %85 = tpu.matmul %84, %72, %cst_41 {dimension_numbers = #tpu.dot_dimension_numbers<[1], [0], [0], [1], [0, 0, 1, 1], [], []>} : vector<8x8xbf16>, vector<8x8xbf16>, vector<8x8xf32> -> vector<8x8xf32>
    %c0_42 = arith.constant 0 : index
    %c24_43 = arith.constant 24 : index
    %86 = vector.load %arg23[%c0_42, %c24_43] : memref<8x32xf32, #tpu.memory_space<vmem>>, vector<8x8xf32>
    tpu.vector_store %arg23[%c0_42, %c24_43], %85 {strides = array<i32>} : memref<8x32xf32, #tpu.memory_space<vmem>>, vector<8x8xf32>,
    %c0_44 = arith.constant 0 : index
    %c0_45 = arith.constant 0 : index
    %87 = vector.load %arg23[%c0_44, %c0_45] : memref<8x32xf32, #tpu.memory_space<vmem>>, vector<8x32xf32>
    %88 = arith.truncf %87 : vector<8x32xf32> to vector<8x32xbf16>
    %c0_46 = arith.constant 0 : index
    %c0_47 = arith.constant 0 : index
    %89 = vector.load %arg11[%c0_46, %c0_47] : memref<32x32xbf16, #tpu.memory_space<vmem>>, vector<32x32xbf16>
    %cst_48 = arith.constant dense<0.000000e+00> : vector<8x32xf32>
    %90 = tpu.matmul %88, %89, %cst_48 {dimension_numbers = #tpu.dot_dimension_numbers<[1], [0], [0], [1], [0, 0, 1, 1], [], []>} : vector<8x32xbf16>, vector<32x32xbf16>, vector<8x32xf32> -> vector<8x32xf32>
    %c0_49 = arith.constant 0 : index
    %c0_50 = arith.constant 0 : index
    %91 = vector.load %arg12[%c0_49, %c0_50] : memref<1x32xf32, #tpu.memory_space<vmem>>, vector<1x32xf32>
    %92 = vector.broadcast %91 : vector<1x32xf32> to vector<8x32xf32>
    %93 = arith.addf %90, %92 : vector<8x32xf32>
    %94 = arith.addf %93, %7 : vector<8x32xf32>
    %c0_51 = arith.constant 0 : index
    %c0_52 = arith.constant 0 : index
    %95 = vector.load %arg13[%c0_51, %c0_52] : memref<1x32xf32, #tpu.memory_space<vmem>>, vector<1x32xf32>
    %c0_53 = arith.constant 0 : index
    %c0_54 = arith.constant 0 : index
    %96 = vector.load %arg14[%c0_53, %c0_54] : memref<1x32xf32, #tpu.memory_space<vmem>>, vector<1x32xf32>
    %cst_55 = arith.constant dense<0.000000e+00> : vector<8xf32>
    %97 = vector.multi_reduction <add>, %94, %cst_55 [1] : vector<8x32xf32> to vector<8xf32>
    %98 = vector.shape_cast %97 : vector<8xf32> to vector<8x1xf32>
    %cst_56 = arith.constant 3.200000e+01 : f32
    %99 = vector.broadcast %cst_56 : f32 to vector<8x1xf32>
    %100 = arith.divf %98, %99 : vector<8x1xf32>
    %101 = vector.broadcast %100 : vector<8x1xf32> to vector<8x32xf32>
    %102 = arith.subf %94, %101 : vector<8x32xf32>
    %103 = arith.mulf %102, %102 : vector<8x32xf32>
    %cst_57 = arith.constant dense<0.000000e+00> : vector<8xf32>
    %104 = vector.multi_reduction <add>, %103, %cst_57 [1] : vector<8x32xf32> to vector<8xf32>
    %105 = vector.shape_cast %104 : vector<8xf32> to vector<8x1xf32>
    %cst_58 = arith.constant 3.200000e+01 : f32
    %106 = vector.broadcast %cst_58 : f32 to vector<8x1xf32>
    %107 = arith.divf %105, %106 : vector<8x1xf32>
    %108 = vector.broadcast %100 : vector<8x1xf32> to vector<8x32xf32>
    %109 = arith.subf %94, %108 : vector<8x32xf32>
    %cst_59 = arith.constant 9.99999997E-7 : f32
    %110 = vector.broadcast %cst_59 : f32 to vector<8x1xf32>
    %111 = arith.addf %107, %110 : vector<8x1xf32>
    %112 = math.rsqrt %111 : vector<8x1xf32>
    %113 = vector.broadcast %112 : vector<8x1xf32> to vector<8x32xf32>
    %114 = arith.mulf %109, %113 : vector<8x32xf32>
    %115 = vector.broadcast %95 : vector<1x32xf32> to vector<8x32xf32>
    %116 = arith.mulf %114, %115 : vector<8x32xf32>
    %117 = vector.broadcast %96 : vector<1x32xf32> to vector<8x32xf32>
    %118 = arith.addf %116, %117 : vector<8x32xf32>
    %119 = arith.truncf %118 : vector<8x32xf32> to vector<8x32xbf16>
    %c0_60 = arith.constant 0 : index
    %c0_61 = arith.constant 0 : index
    %120 = vector.load %arg15[%c0_60, %c0_61] : memref<32x64xbf16, #tpu.memory_space<vmem>>, vector<32x64xbf16>
    %cst_62 = arith.constant dense<0.000000e+00> : vector<8x64xf32>
    %121 = tpu.matmul %119, %120, %cst_62 {dimension_numbers = #tpu.dot_dimension_numbers<[1], [0], [0], [1], [0, 0, 1, 1], [], []>} : vector<8x32xbf16>, vector<32x64xbf16>, vector<8x64xf32> -> vector<8x64xf32>
    %c0_63 = arith.constant 0 : index
    %c0_64 = arith.constant 0 : index
    %122 = vector.load %arg16[%c0_63, %c0_64] : memref<1x64xf32, #tpu.memory_space<vmem>>, vector<1x64xf32>
    %123 = vector.broadcast %122 : vector<1x64xf32> to vector<8x64xf32>
    %124 = arith.addf %121, %123 : vector<8x64xf32>
    %cst_65 = arith.constant 5.000000e-01 : f32
    %125 = vector.broadcast %cst_65 : f32 to vector<8x64xf32>
    %126 = arith.mulf %125, %124 : vector<8x64xf32>
    %cst_66 = arith.constant 0.707106769 : f32
    %127 = vector.broadcast %cst_66 : f32 to vector<8x64xf32>
    %128 = arith.mulf %124, %127 : vector<8x64xf32>
    %129 = math.erf %128 : vector<8x64xf32>
    %cst_67 = arith.constant 1.000000e+00 : f32
    %130 = vector.broadcast %cst_67 : f32 to vector<8x64xf32>
    %131 = arith.addf %130, %129 : vector<8x64xf32>
    %132 = arith.mulf %126, %131 : vector<8x64xf32>
    %133 = arith.truncf %132 : vector<8x64xf32> to vector<8x64xbf16>
    %c0_68 = arith.constant 0 : index
    %c0_69 = arith.constant 0 : index
    %134 = vector.load %arg17[%c0_68, %c0_69] : memref<64x32xbf16, #tpu.memory_space<vmem>>, vector<64x32xbf16>
    %cst_70 = arith.constant dense<0.000000e+00> : vector<8x32xf32>
    %135 = tpu.matmul %133, %134, %cst_70 {dimension_numbers = #tpu.dot_dimension_numbers<[1], [0], [0], [1], [0, 0, 1, 1], [], []>} : vector<8x64xbf16>, vector<64x32xbf16>, vector<8x32xf32> -> vector<8x32xf32>
    %c0_71 = arith.constant 0 : index
    %c0_72 = arith.constant 0 : index
    %136 = vector.load %arg18[%c0_71, %c0_72] : memref<1x32xf32, #tpu.memory_space<vmem>>, vector<1x32xf32>
    %137 = vector.broadcast %136 : vector<1x32xf32> to vector<8x32xf32>
    %138 = arith.addf %135, %137 : vector<8x32xf32>
    %139 = arith.addf %94, %138 : vector<8x32xf32>
    %c0_73 = arith.constant 0 : index
    %c0_74 = arith.constant 0 : index
    %c0_75 = arith.constant 0 : index
    %140 = vector.load %arg19[%c0_73, %c0_74, %c0_75] : memref<1x8x32xf32, #tpu.memory_space<vmem>>, vector<1x8x32xf32>
    %141 = vector.shape_cast %140 : vector<1x8x32xf32> to vector<8x32xf32>
    %142 = vector.shape_cast %139 : vector<8x32xf32> to vector<1x8x32xf32>
    tpu.vector_store %arg19[%c0_73, %c0_74, %c0_75], %142 {strides = array<i32>} : memref<1x8x32xf32, #tpu.memory_space<vmem>>, vector<1x8x32xf32>,
    return
  }
  func.func @transform_0(%arg0: i32, %arg1: i32) -> (i32, i32, i32) {
    %c0_i32 = arith.constant 0 : i32
    %c0_i32_0 = arith.constant 0 : i32
    %c0_i32_1 = arith.constant 0 : i32
    return %arg0, %c0_i32, %c0_i32_0 : i32, i32, i32
  }
  func.func @transform_1(%arg0: i32, %arg1: i32) -> (i32, i32) {
    %c0_i32 = arith.constant 0 : i32
    %c0_i32_0 = arith.constant 0 : i32
    %c0_i32_1 = arith.constant 0 : i32
    return %c0_i32, %c0_i32_0 : i32, i32
  }
  func.func @transform_2(%arg0: i32, %arg1: i32) -> (i32, i32) {
    %c0_i32 = arith.constant 0 : i32
    %c0_i32_0 = arith.constant 0 : i32
    %c0_i32_1 = arith.constant 0 : i32
    return %c0_i32, %c0_i32_0 : i32, i32
  }
  func.func @transform_3(%arg0: i32, %arg1: i32) -> (i32, i32) {
    %c0_i32 = arith.constant 0 : i32
    %c0_i32_0 = arith.constant 0 : i32
    %c0_i32_1 = arith.constant 0 : i32
    return %c0_i32, %c0_i32_0 : i32, i32
  }
  func.func @transform_4(%arg0: i32, %arg1: i32) -> (i32, i32) {
    %c0_i32 = arith.constant 0 : i32
    %c0_i32_0 = arith.constant 0 : i32
    %c0_i32_1 = arith.constant 0 : i32
    return %c0_i32, %c0_i32_0 : i32, i32
  }
  func.func @transform_5(%arg0: i32, %arg1: i32) -> (i32, i32) {
    %c0_i32 = arith.constant 0 : i32
    %c0_i32_0 = arith.constant 0 : i32
    %c0_i32_1 = arith.constant 0 : i32
    return %c0_i32, %c0_i32_0 : i32, i32
  }
  func.func @transform_6(%arg0: i32, %arg1: i32) -> (i32, i32) {
    %c0_i32 = arith.constant 0 : i32
    %c0_i32_0 = arith.constant 0 : i32
    %c0_i32_1 = arith.constant 0 : i32
    return %c0_i32, %c0_i32_0 : i32, i32
  }
  func.func @transform_7(%arg0: i32, %arg1: i32) -> (i32, i32) {
    %c0_i32 = arith.constant 0 : i32
    %c0_i32_0 = arith.constant 0 : i32
    %c0_i32_1 = arith.constant 0 : i32
    return %c0_i32, %c0_i32_0 : i32, i32
  }
  func.func @transform_8(%arg0: i32, %arg1: i32) -> (i32, i32) {
    %c0_i32 = arith.constant 0 : i32
    %c0_i32_0 = arith.constant 0 : i32
    %c0_i32_1 = arith.constant 0 : i32
    return %c0_i32, %c0_i32_0 : i32, i32
  }
  func.func @transform_9(%arg0: i32, %arg1: i32) -> (i32, i32) {
    %c0_i32 = arith.constant 0 : i32
    %c0_i32_0 = arith.constant 0 : i32
    %c0_i32_1 = arith.constant 0 : i32
    return %c0_i32, %c0_i32_0 : i32, i32
  }
  func.func @transform_10(%arg0: i32, %arg1: i32) -> (i32, i32) {
    %c0_i32 = arith.constant 0 : i32
    %c0_i32_0 = arith.constant 0 : i32
    %c0_i32_1 = arith.constant 0 : i32
    return %c0_i32, %c0_i32_0 : i32, i32
  }
  func.func @transform_11(%arg0: i32, %arg1: i32) -> (i32, i32) {
    %c0_i32 = arith.constant 0 : i32
    %c0_i32_0 = arith.constant 0 : i32
    %c0_i32_1 = arith.constant 0 : i32
    return %c0_i32, %c0_i32_0 : i32, i32
  }
  func.func @transform_12(%arg0: i32, %arg1: i32) -> (i32, i32) {
    %c0_i32 = arith.constant 0 : i32
    %c0_i32_0 = arith.constant 0 : i32
    %c0_i32_1 = arith.constant 0 : i32
    return %c0_i32, %c0_i32_0 : i32, i32
  }
  func.func @transform_13(%arg0: i32, %arg1: i32) -> (i32, i32) {
    %c0_i32 = arith.constant 0 : i32
    %c0_i32_0 = arith.constant 0 : i32
    %c0_i32_1 = arith.constant 0 : i32
    return %c0_i32, %c0_i32_0 : i32, i32
  }
  func.func @transform_14(%arg0: i32, %arg1: i32) -> (i32, i32) {
    %c0_i32 = arith.constant 0 : i32
    %c0_i32_0 = arith.constant 0 : i32
    %c0_i32_1 = arith.constant 0 : i32
    return %c0_i32, %c0_i32_0 : i32, i32
  }
  func.func @transform_15(%arg0: i32, %arg1: i32) -> (i32, i32) {
    %c0_i32 = arith.constant 0 : i32
    %c0_i32_0 = arith.constant 0 : i32
    %c0_i32_1 = arith.constant 0 : i32
    return %c0_i32, %c0_i32_0 : i32, i32
  }
  func.func @transform_16(%arg0: i32, %arg1: i32) -> (i32, i32) {
    %c0_i32 = arith.constant 0 : i32
    %c0_i32_0 = arith.constant 0 : i32
    %c0_i32_1 = arith.constant 0 : i32
    return %c0_i32, %c0_i32_0 : i32, i32
  }
  func.func @transform_17(%arg0: i32, %arg1: i32) -> (i32, i32, i32) {
    %c0_i32 = arith.constant 0 : i32
    %c0_i32_0 = arith.constant 0 : i32
    return %arg0, %arg1, %c0_i32 : i32, i32, i32
  }
}

</mosaic_0001>

<bundles_post_ra>
// kernel: tpu_custom_call.1
= control target key start
LH: loop header
LB: loop body
LE: loop exit
PB: predicated region body
PF: predicated region fallthrough
CT: control target
= control target key end

     0   :  { %s2221_s0 = inlined_call_operand.vmem [shape: f32[2,8,32], index: 0, kind: input, shape index: {}]   ;;  %s2222_s1 = inlined_call_operand.hbm [shape: f32[1,32], index: 1, kind: input, shape index: {}]   ;;  %s2223_s2 = inlined_call_operand.vmem [shape: f32[1,32], index: 2, kind: input, shape index: {}]   ;;  %s2224_s3 = inlined_call_operand.vmem [shape: bf16[32,32], index: 3, kind: input, shape index: {}]   ;;  %s2225_s4 = inlined_call_operand.vmem [shape: f32[1,32], index: 4, kind: input, shape index: {}]   ;;  %s2226_s5 = inlined_call_operand.vmem [shape: bf16[32,32], index: 5, kind: input, shape index: {}]   ;;  %s2227_s6 = inlined_call_operand.vmem [shape: f32[1,32], index: 6, kind: input, shape index: {}]   ;;  %s2228_s7 = inlined_call_operand.hbm [shape: bf16[32,32], index: 7, kind: input, shape index: {}]   ;;  %s2229_s8 = inlined_call_operand.vmem [shape: f32[1,32], index: 8, kind: input, shape index: {}]   ;;  %s2230_s9 = inlined_call_operand.hbm [shape: bf16[32,32], index: 9, kind: input, shape index: {}]   ;;  %s2231_s10 = inlined_call_operand.vmem [shape: f32[1,32], index: 10, kind: input, shape index: {}]   ;;  %s2232_s11 = inlined_call_operand.vmem [shape: f32[1,32], index: 11, kind: input, shape index: {}]   ;;  %s2233_s12 = inlined_call_operand.vmem [shape: f32[1,32], index: 12, kind: input, shape index: {}]   ;;  %s2234_s13 = inlined_call_operand.hbm [shape: bf16[32,64], index: 13, kind: input, shape index: {}]   ;;  %s2235_s14 = inlined_call_operand.vmem [shape: f32[1,64], index: 14, kind: input, shape index: {}]   ;;  %s2236_s15 = inlined_call_operand.vmem [shape: bf16[64,32], index: 15, kind: input, shape index: {}]   ;;  %s2237_s16 = inlined_call_operand.vmem [shape: f32[1,32], index: 16, kind: input, shape index: {}]   ;;  %s2238_s17 = inlined_call_operand.hbm [shape: f32[2,8,32], index: 17, kind: output, shape index: {}]  }
   0x1   :  { %2251 = sst [smem:[#allocation28_spill]] %s2221_s0 }
   0x2   :  { %2252 = sst [smem:[#allocation29_spill]] %s2222_s1 }
   0x3   :  { %2253 = sst [smem:[#allocation30_spill]] %s2228_s7 }
   0x4   :  { %2254 = sst [smem:[#allocation31_spill]] %s2235_s14 }
   0x5   :  { %2255 = sst [smem:[#allocation32_spill]] %s2236_s15 }
   0x6   :  { %2256 = sst [smem:[#allocation33_spill]] %s2237_s16 }
   0x7   :  { %2257 = sst [smem:[#allocation34_spill]] %s2238_s17 }
   0x8   :  { %22 = vsyncpa [#allocation7], 0 }
   0x9   :  { %23 = vsyncpa [#allocation10], 0 }
   0xa   :  { %24 = vsyncpa [#allocation13], 0 }
   0xb   :  { %25 = vsyncpa [#allocation8], 0 }
   0xc   :  { %27 = vsyncpa [#allocation8 + $0x1], 0  ;;  %s1960_s24 = smov 0   ;;  %s1962_s25 = smov 0  }
   0xd   :  { %s1964_s26 = smov 0   ;;  %s1966_s27 = smov 0  }
   0xe   :  { %s1968_s28 = smov 0   ;;  %s1970_s29 = smov 0  }
   0xf LB: > { %2258 = sst [smem:[#allocation19_spill]] %s1835_s24  ;;  %s1402_s0 = sadd.s32 4294967295, %s1855_s29   ;;  %s1855_s29 = sphi %s1970_s29, %s33_s29   ;;  %s1851_s28 = sphi %s1968_s28, %s2288_s28   ;;  %s1847_s27 = sphi %s1966_s27, %s2287_s27   ;;  %s1843_s26 = sphi %s1964_s26, %s2286_s26   ;;  %s1839_s25 = sphi %s1962_s25, %s2285_s25   ;;  %s1835_s24 = sphi %s1960_s24, %s2284_s24  }
  0x10   : > { %2259 = sst [smem:[#allocation20_spill]] %s1839_s25  ;;  %s1403_s30 = sadd.s32 4294967294, %s1855_s29  }
  0x11   : > { %2260 = sst [smem:[#allocation21_spill]] %s1843_s26  ;;  %s45_s18 = sadd.s32 1, %s1851_s28 }
  0x12   : > { %2261 = sst [smem:[#allocation22_spill]] %s1851_s28  ;;  %s416_s19 = sadd.s32 1, %s1843_s26 }
  0x13   : > { %2262 = sst [smem:[#allocation23_spill]] %s1855_s29  ;;  %p47_p0 = scmp.ge.s32.totalorder %s45_s18, 2 }
  0x14   : > { %p426_p1 = scmp.ne.s32.totalorder %s1843_s26, %s1839_s25  ;;  %p427_p2 = scmp.eq.s32.totalorder %s1402_s0, 1 }
  0x15   : > { %p432_p3 = scmp.ne.s32.totalorder %s1839_s25, %s1835_s24  ;;  %s2290_s18 = smov (%p47_p0, %s45_s18), 0 }
  0x16   : > { %2263 = sst [smem:[#allocation24_spill]] %s2290_s18  ;;  %p2000_p4 = por %p427_p2, %p426_p1 }
  0x17   : > { %p433_p5 = scmp.eq.s32.totalorder %s1403_s30, 1  ;;  %s411_s20 = ssub.s32 %s1851_s28, %s2290_s18 }
  0x18   : > { %s2264_s1 = scalar_select %p2000_p4, 1, 0 }
  0x19   : > { %p1404_p6 = scmp.ge.s32.totalorder %s1855_s29, 1  ;;  %p414_p7 = scmp.eq.s32.totalorder %s411_s20, 0 }
  0x1a   : > { %2265 = sst [smem:[#allocation25_spill]] %s2264_s1  ;;  %p2007_p8 = por %p433_p5, %p432_p3 }
  0x1b   : > { %p440_p9 = scmp.lt.s32.totalorder %s1855_s29, 3  ;;  %p2019_p11 = scmp.eq.s32.totalorder %s1402_s0, 0 }
  0x1c   : > { %s2266_s21 = scalar_select %p2007_p8, 1, 0 }
  0x1d   : > { %s2013_s22 = scalar_select %p414_p7, %s1843_s26, %s416_s19  }
  0x1e   : > { %2267 = sst [smem:[#allocation26_spill]] %s2266_s21  ;;  %p2015_p10 = pnand %p1404_p6, %p440_p9 }
  0x1f   : > { %2268 = sst [smem:[#allocation27_spill]] %s2013_s22  ;;  %s1857_s28 = smov [#allocation9]  }
  0x20   : > { %s2271_s7 = sld [smem:[#allocation30_spill]]  ;;  %p1524_p12 = pneg %p2015_p10 }
  0x21   : > { %s480_s19 = sshll.u32 %s1857_s28, 4  ;;  %s1858_s0 = smov 64   ;;  %s481_s19 = int_to_ptr.vmem [resolvable:$true] %s480_s19 }
  0x22   : > { %p2030_p13 = pnand %p2019_p11, %p1524_p12  ;;  %s1859_s26 = smov 4  }
  0x23   : > { %s1860_s28 = smov [#allocation6]   ;;  %s495_s16 = sshll.u32 %s2230_s9, 4  ;;  %s496_s16 = int_to_ptr.hbm [resolvable:$true] %s495_s16 }
  0x24   : > { %s454_s29 = sshll.u32 %s1860_s28, 4  ;;  %s1861_s25 = smov [#allocation11]   ;;  %s455_s29 = int_to_ptr.vmem [resolvable:$true] %s454_s29 }
  0x25   : > { %s497_s15 = sshll.u32 %s1861_s25, 4  ;;  %s498_s15 = int_to_ptr.vmem [resolvable:$true] %s497_s15 }
  0x26   : > { %s478_s20 = sshll.u32 %s2271_s7, 4  ;;  %s2273_s7 = sld [smem:[#allocation29_spill]]  ;;  %s479_s20 = int_to_ptr.hbm [resolvable:$true] %s478_s20 }
  0x27   : > { %1530 = dma.hbm_to_vmem [thread:$0]  (!%p2030_p13), %s479_s20, 256, %s481_s19, [#allocation10], %s1858_s0, %s1858_s0, %s1859_s26  }
  0x28   : > { %s518_s19 = sshll.u32 %s2234_s13, 4  ;;  %s519_s19 = int_to_ptr.hbm [resolvable:$true] %s518_s19 }
  0x29   : > { %1533 = dma.hbm_to_vmem [thread:$0]  (!%p2030_p13), %s496_s16, 256, %s498_s15, [#allocation10], %s1858_s0, %s1858_s0, %s1859_s26  }
  0x2b   : > { %552 = sbr.rel (%p2015_p10) target bundleno = 1991 (0x7c7), region = 88 }
  0x2c   : > { %s452_s21 = sshll.u32 %s2273_s7, 4  ;;  %s1862_s7 = smov [#allocation12]   ;;  %s453_s21 = int_to_ptr.hbm [resolvable:$true] %s452_s21 }
  0x2d   : > { %1527 = dma.hbm_to_vmem [thread:$0]  (!%p2030_p13), %s453_s21, 16, %s455_s29, [#allocation7]  }
  0x2e   : > { %s520_s18 = sshll.u32 %s1862_s7, 4  ;;  %s521_s18 = int_to_ptr.vmem [resolvable:$true] %s520_s18 }
  0x2f   : > { %1536 = dma.hbm_to_vmem [thread:$0]  (!%p2030_p13), %s519_s19, 256, %s521_s18, [#allocation13], %s1858_s0, %s1858_s0, %s1859_s26  }
  0x30   : > { %1818 = dma.done.wait (%p2019_p11), [#allocation7], 16  }
  0x31   : > { %1820 = vsyncadd (%p2019_p11), [#allocation7], 4294967280 }
  0x32   : > { %1822 = dma.done.wait (%p2019_p11), [#allocation10], 512  }
  0x33   : > { %1824 = vsyncadd (%p2019_p11), [#allocation10], 4294966784 }
  0x34   : > { %1826 = dma.done.wait (%p2019_p11), [#allocation13], 256  }
  0x35   : > { %1828 = vsyncadd (%p2019_p11), [#allocation13], 4294967040  ;;  %p619_p0 = scmp.lt.s32.totalorder %s1847_s27, 1  ;;  %s2274_s25 = sld [smem:[#allocation28_spill]]  ;;  %vm631_vm0 = vcmask 261120   ;;  %v1863_v2 = vmov 32.0  }
  0x36   : > { %1621 = vrcp.f32 %v1863_v2  ;;  %v1493_v14 = vld [vmem:[%s2226_s5 + $0x8] sm:$0xff]  ;;  %v1495_v15 = vld [vmem:[#allocation9 + $0x8] sm:$0xff]  ;;  %v1494_v17 = vld [vmem:[#allocation9] sm:$0xff]  ;;  %vm670_vm5 = vcmask 257024   ;;  %vm793_vm6 = vcmask 64512   ;;  %vm828_vm7 = vcmask 1043456  }
  0x37   : > { %s620_s14 = scalar_select %p619_p0, %s1847_s27, 1  ;;  %701 = vmatpush.bf16.msra.mxu0 %v1493_v14  ;;  %736 = vmatpush.bf16.msra.mxu1 %v1495_v15  ;;  %v1492_v16 = vld [vmem:[%s2226_s5] sm:$0xff]  ;;  %v1497_v18 = vld [vmem:[%s2224_s3 + $0x8] sm:$0xff]  ;;  %v1611_v29 = vld [vmem:[#allocation6] ss:$0 sm:$0xff]  ;;  %vm915_vm8 = vcmask 130112  }
  0x38   : > { %783 = vmatpush.bf16.msra.mxu2 %v1497_v18  ;;  %v1496_v20 = vld [vmem:[%s2224_s3] sm:$0xff]  ;;  %s1864_s17 = smov 112   ;;  %s1867_s24 = smov 8   ;;  %vm985_vm9 = vcmask 195712   ;;  %vm1055_vm10 = vcmask 261312  }
  0x39   : > { %s1416_s15 = sshll.u32 %s620_s14, 3  ;;  %v1612_v32 = vld [vmem:[%s2223_s2] ss:$0 sm:$0xff]  ;;  %s1868_s29 = smov 16  }
  0x3a   : > { %v1613_v37 = vld [vmem:[%s2227_s6] ss:$0 sm:$0xff]  ;;  %s1869_s1 = smov 24   ;;  %s2275_s7 = sld [smem:[#allocation31_spill]] }
  0x3b   : > { %s622_s26 = scalar_lea.vmem %s2274_s25, %s1416_s15  ;;  %702 = vmatpush.bf16.msra.mxu0 %v1492_v16  ;;  %737 = vmatpush.bf16.msra.mxu1 %v1494_v17  ;;  %v1614_v38 = vld [vmem:[%s2229_s8] ss:$0 sm:$0xff]  ;;  %s1865_s25 = smov 120  }
  0x3c   : > { %v2070_v0 = vld [vmem:[%s622_s26] sm:$0xff]  ;;  %v1622_v3 = vpop.eup %1621  ;;  %784 = vmatpush.bf16.msra.mxu2 %v1496_v20  ;;  %s1866_s26 = smov 104   ;;  %s2276_s15 = sld [smem:[#allocation32_spill]] }
  0x3d   : > { %v632_v1 = vsel %vm631_vm0, %v2070_v0, 0.0  ;;  %v636_v4 = vmul.f32 32.0, %v1622_v3  ;;  %vm640_vm1 = vweird.f32 %v1622_v3  ;;  %v1615_v47 = vld [vmem:[%s2225_s4] ss:$0 sm:$0xff]  ;;  %s1489_s23 = sshll.u32 %s1847_s27, 3  ;;  %s2278_s28 = sld [smem:[#allocation33_spill]] }
  0x3e   : > { %633 = vadd.xlane.f32.xlu0 %v632_v1 }
  0x3f   : > { %v637_v5 = vsub.f32 1.0, %v636_v4 }
  0x41   : > { %v638_v6 = vmul.f32 %v1622_v3, %v637_v5 }
  0x43   : > { %v639_v7 = vadd.f32 %v1622_v3, %v638_v6 }
  0x45   : > { %v2074_v8 = vsel %vm640_vm1, %v1622_v3, %v639_v7 }
  0xb1   : > { %v634_v9 = vpop.xlane.xlu0 %633 }
  0xb2   : > { %v642_v10 = vmul.f32 %v2074_v8, %v634_v9 }
  0xb4   : > { %v643_v11 = vsub.f32 %v2070_v0, %v642_v10 }
  0xb6   : > { %v644_v12 = vmul.f32 %v643_v11, %v643_v11 }
  0xb8   : > { %v645_v13 = vsel %vm631_vm0, %v644_v12, 0.0 }
  0xb9   : > { %646 = vadd.xlane.f32.xlu0 %v645_v13 }
 0x12c   : > { %v647_v19 = vpop.xlane.xlu0 %646 }
 0x12d   : > { %v648_v21 = vmul.f32 %v647_v19, %v2074_v8 }
 0x12f   : > { %v649_v22 = vadd.f32 1e-06, %v648_v21 }
 0x131   : > { %1623 = vrsqrt.f32 %v649_v22  ;;  %vm656_vm3 = vweird.f32 %v649_v22 }
 0x137   : > { %v1624_v23 = vpop.eup %1623 }
 0x138   : > { %v651_v24 = vmul.f32 %v1624_v23, %v649_v22  ;;  %vm657_vm2 = vweird.f32 %v1624_v23 }
 0x139   : > { %vm658_vm4 = vmor %vm656_vm3, %vm657_vm2  ;;  %vm1253_vm3 = vcmask 523264  }
 0x13a   : > { %v652_v25 = vmul.f32 %v1624_v23, %v651_v24 }
 0x13c   : > { %v653_v26 = vmul.f32 0.5, %v652_v25 }
 0x13e   : > { %v654_v27 = vsub.f32 1.5, %v653_v26 }
 0x140   : > { %v655_v28 = vmul.f32 %v1624_v23, %v654_v27 }
 0x142   : > { %v659_v30 = vsel %vm658_vm4, %v1624_v23, %v655_v28 }
 0x143   : > { %v660_v31 = vmul.f32 %v659_v30, %v643_v11 }
 0x145   : > { %v664_v33 = vmul.f32 %v1611_v29, %v660_v31 }
 0x147   : > { %v668_v34 = vadd.f32 %v1612_v32, %v664_v33 }
 0x149   : > { %v669_v35 = vpack.c.bf16 %v668_v34, %v668_v34 }
 0x14b   : > { %671 = vst.msk [vmem:[#allocation2] sm:$0xf] %vm670_vm5, %v669_v35  ;;  %1425 = vmatmul.msk.bf16.vlgmr.msra.gmra.mxu0 %vm631_vm0, %v669_v35  ;;  %1434 = vmatmul.msk.bf16.vlgmr.msra.gmra.mxu1 %vm631_vm0, %v669_v35 }
 0x152   : > { %v752_v36 = vld [vmem:[#allocation2] sm:$0xf] }
 0x153   : > { %1443 = vmatmul.msk.bf16.vlgmr.msra.gmra.mxu2 %vm631_vm0, %v752_v36 }
 0x1c8   : > { %v704_v39 = vpop.f32.mrf.mxu0  ;;  %v739_v40 = vpop.f32.mrf.mxu1 }
 0x1c9   : > { %v705_v41 = vadd.f32 %v1613_v37, %v704_v39  ;;  %v740_v42 = vadd.f32 %v1614_v38, %v739_v40 }
 0x1cb   : > { %v708_v43 = vpack.c.bf16 %v705_v41, %v705_v41  ;;  %v743_v44 = vpack.c.bf16 %v740_v42, %v740_v42 }
 0x1cd   : > { %709 = vst.msk [vmem:[#allocation3] sm:$0xf] %vm670_vm5, %v708_v43 }
 0x1ce   : > { %744 = vst.msk [vmem:[#allocation4] sm:$0xf] %vm670_vm5, %v743_v44 }
 0x1d0   : > { %v706_v45 = vpop.f32.mrf.mxu0  ;;  %v741_v46 = vpop.f32.mrf.mxu1 }
 0x1d4   : > { %v791_v48 = vld [vmem:[#allocation3] sm:$0xf] }
 0x1d5   : > { %v917_v49 = vld [vmem:[#allocation3] sm:$0xf]  ;;  %v798_v51 = vsel %vm793_vm6, %v791_v48, 0  ;;  %v792_v52 = vld [vmem:[#allocation4] sm:$0xf] }
 0x1d6   : > { %v846_v50 = vld [vmem:[#allocation3] sm:$0xf]  ;;  %v922_v53 = vunpack.c.l.b16 %v917_v49  ;;  %v786_v55 = vpop.f32.mrf.mxu2  ;;  %807 = vmatpush.bf16.xpose.msra.mxu3 %v798_v51  ;;  %v830_v56 = vsel %vm828_vm7, %v792_v52, 0  ;;  %v847_v48 = vld [vmem:[#allocation4] sm:$0xf] }
 0x1d7   : > { %v852_v54 = vunpack.c.l.b16 %v846_v50  ;;  %v787_v57 = vadd.f32 %v1615_v47, %v786_v55  ;;  %839 = vmatpush.bf16.msrb.mxu0 %v830_v56  ;;  %v987_v60 = vld [vmem:[#allocation3] sm:$0xf]  ;;  %v888_v49 = vunpack.c.l.b16 %v847_v48  ;;  %v918_v50 = vld [vmem:[#allocation4] sm:$0xf] }
 0x1d8   : > { %v923_v58 = vpack.c.b16 %v922_v53, %v922_v53  ;;  %v992_v62 = vunpack.c.l.b16 %v987_v60  ;;  %v958_v52 = vunpack.c.l.b16 %v918_v50 }
 0x1d9   : > { %v853_v59 = vpack.c.b16 %v852_v54, %v852_v54  ;;  %v790_v61 = vpack.c.bf16 %v787_v57, %v787_v57  ;;  %v889_v51 = vpack.c.b16 %v888_v49, %v888_v49  ;;  %v988_v54 = vld [vmem:[#allocation4] sm:$0xf]  ;;  %v1617_v49 = vld [vmem:[%s2232_s11] ss:$0 sm:$0xff] }
 0x1da   : > { %924 = vrot.lane.b32.xlu2 %v923_v58, %s1864_s17  ;;  %v993_v1 = vpack.c.b16 %v992_v62, %v992_v62  ;;  %v959_v53 = vpack.c.b16 %v958_v52, %v958_v52  ;;  %v1028_v55 = vunpack.c.l.b16 %v988_v54 }
 0x1db   : > { %854 = vrot.lane.b32.xlu1 %v853_v59, %s1865_s25  ;;  %919 = vrot.lane.b32.xlu0 %v790_v61, %s1864_s17 }
 0x1dc   : > { %v1029_v56 = vpack.c.b16 %v1028_v55, %v1028_v55  ;;  %v1619_v55 = vld [vmem:[%s2275_s7] ss:$0 sm:$0xff]  ;;  %s2279_s7 = sld [smem:[#allocation34_spill]] }
 0x1dd   : > { %1444 = vmatmul.msk.bf16.vlgmr.msra.gmra.mxu3 %vm793_vm6, %v790_v61 }
 0x1de   : > { %v788_v63 = vpop.f32.mrf.mxu2 }
 0x1e2   : > { %994 = vrot.lane.b32.xlu2 %v993_v1, %s1866_s26  ;;  %s1284_s14 = scalar_lea.hbm %s2279_s7, %s1489_s23 }
 0x1e3   : > { %849 = vrot.lane.b32.xlu1 %v790_v61, %s1865_s25 }
 0x1eb   : > { %989 = vrot.lane.b32.xlu1 %v790_v61, %s1866_s26 }
 0x234   : > { %v925_v2 = vpop.permute.xlu2 %924 }
 0x235   : > { %v930_v3 = vsel %vm793_vm6, %v925_v2, 0 }
 0x236   : > { %939 = vmatpush.bf16.xpose.msrb.mxu3 %v930_v3 }
 0x23c   : > { %v995_v4 = vpop.permute.xlu2 %994 }
 0x23d   : > { %v1000_v7 = vsel %vm793_vm6, %v995_v4, 0 }
 0x24d   : > { %v855_v5 = vpop.permute.xlu1 %854  ;;  %v920_v9 = vpop.permute.xlu0 %919 }
 0x24e   : > { %v860_v6 = vsel %vm793_vm6, %v855_v5, 0  ;;  %1448 = vmatmul.msk.bf16.vlgmr.msrb.gmra.mxu3 %vm793_vm6, %v920_v9 }
 0x24f   : > { %869 = vmatpush.bf16.xpose.msrb.mxu1 %v860_v6 }
 0x255   : > { %v850_v10 = vpop.permute.xlu1 %849 }
 0x256   : > { %1446 = vmatmul.msk.bf16.vlgmr.msrb.gmra.mxu1 %vm793_vm6, %v850_v10 }
 0x257   : > { %1009 = vmatpush.bf16.xpose.msra.mxu1 %v1000_v7 }
 0x25d   : > { %v990_v13 = vpop.permute.xlu1 %989 }
 0x260   : > { %v809_v11 = vpop.f32.mrf.mxu3 }
 0x261   : > { %v813_v12 = vsel %vm793_vm6, %v809_v11, -inf }
 0x262   : > { %814 = vmax.xlane.f32.xlu1 %v813_v12 }
 0x266   : > { %1450 = vmatmul.msk.bf16.vlgmr.msra.gmra.mxu1 %vm793_vm6, %v990_v13 }
 0x268   : > { %v811_v14 = vpop.f32.mrf.mxu3 }
 0x2d1   : > { %v941_v16 = vpop.f32.mrf.mxu3 }
 0x2d2   : > { %v945_v23 = vsel %vm793_vm6, %v941_v16, -inf }
 0x2d3   : > { %v871_v15 = vpop.f32.mrf.mxu1 }
 0x2d4   : > { %v875_v17 = vsel %vm793_vm6, %v871_v15, -inf }
 0x2d5   : > { %876 = vmax.xlane.f32.xlu2 %v875_v17  ;;  %v815_v18 = vpop.xlane.xlu1 %814 }
 0x2d6   : > { %v816_v19 = vsub.f32 %v809_v11, %v815_v18 }
 0x2d8   : > { %v817_v20 = vmul.f32 1.442695, %v816_v19 }
 0x2d9   : > { %v943_v22 = vpop.f32.mrf.mxu3 }
 0x2da   : > { %1625 = vpow2.f32 %v817_v20 }
 0x2db   : > { %v873_v21 = vpop.f32.mrf.mxu1 }
 0x2dd   : > { %946 = vmax.xlane.f32.xlu2 %v945_v23  ;;  %v1499_v23 = vld [vmem:[#allocation11 + $0x8] sm:$0xff] }
 0x2de   : > { %1088 = vmatpush.bf16.msra.mxu3 %v1499_v23 }
 0x2e0   : > { %v1626_v24 = vpop.eup %1625 }
 0x2e1   : > { %v819_v26 = vsel %vm793_vm6, %v1626_v24, 0.0 }
 0x2e2   : > { %820 = vadd.xlane.f32.xlu1 %v819_v26 }
 0x2e3   : > { %v1011_v25 = vpop.f32.mrf.mxu1 }
 0x2e4   : > { %v1015_v27 = vsel %vm793_vm6, %v1011_v25, -inf }
 0x2e5   : > { %1016 = vmax.xlane.f32.xlu0 %v1015_v27 }
 0x2eb   : > { %v1013_v28 = vpop.f32.mrf.mxu1 }
 0x2ec   : > { %v1616_v28 = vld [vmem:[%s2231_s10] ss:$0 sm:$0xff] }
 0x348   : > { %v877_v29 = vpop.xlane.xlu2 %876 }
 0x349   : > { %v878_v30 = vsub.f32 %v871_v15, %v877_v29 }
 0x34b   : > { %v879_v31 = vmul.f32 1.442695, %v878_v30 }
 0x34d   : > { %1627 = vpow2.f32 %v879_v31 }
 0x350   : > { %v947_v32 = vpop.xlane.xlu2 %946 }
 0x351   : > { %v948_v33 = vsub.f32 %v941_v16, %v947_v32 }
 0x353   : > { %v1628_v34 = vpop.eup %1627  ;;  %v949_v35 = vmul.f32 1.442695, %v948_v33 }
 0x354   : > { %v881_v36 = vsel %vm793_vm6, %v1628_v34, 0.0 }
 0x355   : > { %1629 = vpow2.f32 %v949_v35  ;;  %882 = vadd.xlane.f32.xlu2 %v881_v36  ;;  %v821_v37 = vpop.xlane.xlu1 %820 }
 0x356   : > { %1631 = vrcp.f32 %v821_v37 }
 0x358   : > { %v1017_v38 = vpop.xlane.xlu0 %1016 }
 0x359   : > { %v1018_v39 = vsub.f32 %v1011_v25, %v1017_v38 }
 0x35b   : > { %v1630_v40 = vpop.eup %1629  ;;  %v1019_v41 = vmul.f32 1.442695, %v1018_v39  ;;  %v1501_v39 = vld [vmem:[#allocation12 + $0x8] sm:$0xff] }
 0x35c   : > { %v951_v42 = vsel %vm793_vm6, %v1630_v40, 0.0  ;;  %v1632_v43 = vpop.eup %1631 }
 0x35d   : > { %1633 = vpow2.f32 %v1019_v41  ;;  %952 = vadd.xlane.f32.xlu0 %v951_v42  ;;  %v823_v44 = vmul.f32 %v1632_v43, %v1626_v24  ;;  %v1498_v24 = vld [vmem:[#allocation11] sm:$0xff] }
 0x35e   : > { %1089 = vmatpush.bf16.msra.mxu3 %v1498_v24 }
 0x35f   : > { %v824_v45 = vpack.c.bf16 %v823_v44, %v823_v44 }
 0x361   : > { %1445 = vmatmul.msk.bf16.vlgmr.msrb.gmra.mxu0 %vm793_vm6, %v824_v45 }
 0x363   : > { %v1634_v46 = vpop.eup %1633 }
 0x364   : > { %v1021_v47 = vsel %vm793_vm6, %v1634_v46, 0.0 }
 0x365   : > { %1022 = vadd.xlane.f32.xlu1 %v1021_v47 }
 0x36d   : > { %890 = vrot.lane.b32.xlu2 %v889_v51, %s1865_s25  ;;  %s1288_s25 = sshll.u32 %s1284_s14, 4  ;;  %s1289_s25 = int_to_ptr.hbm [resolvable:$true] %s1288_s25 }
 0x371   : > { %960 = vrot.lane.b32.xlu0 %v959_v53, %s1864_s17 }
 0x37e   : > { %1030 = vrot.lane.b32.xlu1 %v1029_v56, %s1866_s26  ;;  %s1779_s26 = sshra.s32 %s1289_s25, 4  ;;  %s1780_s26 = int_to_ptr.hbm [resolvable:$true] %s1779_s26 }
 0x37f   : > { %p1786_p5 = scmp.lt.s32.totalorder %s1780_s26, %s2279_s7 }
 0x3c8   : > { %v883_v57 = vpop.xlane.xlu2 %882 }
 0x3c9   : > { %1635 = vrcp.f32 %v883_v57 }
 0x3cf   : > { %v1636_v58 = vpop.eup %1635 }
 0x3d0   : > { %v885_v59 = vmul.f32 %v1636_v58, %v1628_v34  ;;  %v891_v60 = vpop.permute.xlu2 %890  ;;  %v953_v63 = vpop.xlane.xlu0 %952 }
 0x3d1   : > { %v896_v61 = vsel %vm828_vm7, %v891_v60, 0  ;;  %1637 = vrcp.f32 %v953_v63 }
 0x3d2   : > { %905 = vmatpush.bf16.msrb.mxu2 %v896_v61  ;;  %v886_v62 = vpack.c.bf16 %v885_v59, %v885_v59 }
 0x3d5   : > { %1447 = vmatmul.msk.bf16.vlgmr.msrb.gmra.mxu2 %vm793_vm6, %v886_v62 }
 0x3d7   : > { %v1638_v1 = vpop.eup %1637 }
 0x3d8   : > { %v955_v3 = vmul.f32 %v1638_v1, %v1630_v40  ;;  %v1023_v4 = vpop.xlane.xlu1 %1022  ;;  %v1500_v40 = vld [vmem:[#allocation12] sm:$0xff] }
 0x3d9   : > { %1639 = vrcp.f32 %v1023_v4  ;;  %v1505_v1 = vld [vmem:[%s2276_s15 + $0x18] sm:$0xff] }
 0x3da   : > { %v956_v7 = vpack.c.bf16 %v955_v3, %v955_v3  ;;  %1261 = vmatpush.bf16.msrb.mxu1 %v1505_v1 }
 0x3de   : > { %v841_v2 = vpop.f32.mrf.mxu0 }
 0x3df   : > { %845 = vst.msk [vmem:[#allocation5] sm:$0xff] %vm793_vm6, %v841_v2  ;;  %v1640_v10 = vpop.eup %1639 }
 0x3e0   : > { %v1025_v11 = vmul.f32 %v1640_v10, %v1634_v46 }
 0x3e2   : > { %v1026_v14 = vpack.c.bf16 %v1025_v11, %v1025_v11  ;;  %v1503_v11 = vld [vmem:[%s2276_s15 + $0x8] sm:$0xff] }
 0x3e3   : > { %v961_v5 = vpop.permute.xlu0 %960 }
 0x3e4   : > { %v966_v6 = vsel %vm828_vm7, %v961_v5, 0 }
 0x3e5   : > { %975 = vmatpush.bf16.msra.mxu0 %v966_v6  ;;  %v1504_v6 = vld [vmem:[%s2276_s15 + $0x10] sm:$0xff] }
 0x3e6   : > { %v843_v9 = vpop.f32.mrf.mxu0  ;;  %1262 = vmatpush.bf16.msrb.mxu1 %v1504_v6 }
 0x3e8   : > { %1449 = vmatmul.msk.bf16.vlgmr.msra.gmra.mxu0 %vm793_vm6, %v956_v7 }
 0x3e9   : > { %1165 = vmatpush.bf16.msrb.mxu0 %v1501_v39 }
 0x3ea   : > { %1263 = vmatpush.bf16.msrb.mxu1 %v1503_v11 }
 0x3ed   : > { %1166 = vmatpush.bf16.msrb.mxu0 %v1500_v40 }
 0x3f0   : > { %v1031_v12 = vpop.permute.xlu1 %1030 }
 0x3f1   : > { %v1036_v13 = vsel %vm828_vm7, %v1031_v12, 0 }
 0x3f2   : > { %1045 = vmatpush.bf16.msra.mxu2 %v1036_v13 }
 0x3f5   : > { %1451 = vmatmul.msk.bf16.vlgmr.msra.gmra.mxu2 %vm793_vm6, %v1026_v14 }
 0x458   : > { %v907_v15 = vpop.f32.mrf.mxu2 }
 0x459   : > { %912 = vrot.lane.b32.xlu2 %v907_v15, %s1867_s24  ;;  %v1502_v15 = vld [vmem:[%s2276_s15] sm:$0xff]  ;;  %s1781_s24 = scalar_lea.hbm %s1780_s26, 8 }
 0x45a   : > { %1264 = vmatpush.bf16.msrb.mxu1 %v1502_v15  ;;  %p1782_p1 = scmp.ne.s32.totalorder %s1780_s26, %s1781_s24 }
 0x45c   : > { %p1783_p2 = pnand %p1782_p1, %p2000_p4 }
 0x45e   : > { %p1784_p3 = pneg %p1783_p2 }
 0x460   : > { %v909_v16 = vpop.f32.mrf.mxu2 }
 0x465   : > { %v977_v17 = vpop.f32.mrf.mxu0 }
 0x466   : > { %982 = vrot.lane.b32.xlu2 %v977_v17, %s1868_s29 }
 0x46d   : > { %v979_v18 = vpop.f32.mrf.mxu0 }
 0x478   : > { %v1047_v19 = vpop.f32.mrf.mxu2 }
 0x479   : > { %1052 = vrot.lane.b32.xlu0 %v1047_v19, %s1869_s1  ;;  %s2277_s1 = sld [smem:[#allocation20_spill]] }
 0x47f   : > { %s616_s21 = sand.u32 1, %s2277_s1  }
 0x480   : > { %v1049_v20 = vpop.f32.mrf.mxu2  ;;  %s1415_s22 = sshll.u32 %s616_s21, 3  ;;  %s1273_s27 = scalar_lea.sflag [#allocation8], %s616_s21 }
 0x481   : > { %s618_s16 = scalar_lea.vmem [#allocation14], %s1415_s22  ;;  %s1785_s22 = scalar_lea.hbm %s2279_s7, 16 }
 0x482   : > { %s1286_s17 = sshll.u32 %s618_s16, 4  ;;  %p1787_p6 = scmp.lt.s32.totalorder %s1785_s22, %s1781_s24  ;;  %s1287_s17 = int_to_ptr.vmem [resolvable:$true] %s1286_s17 }
 0x484   : > { %p1788_p7 = por %p1787_p6, %p1786_p5 }
 0x486   : > { %p1789_p9 = pnand %p1788_p7, %p1784_p3 }
 0x4b3   : > { %v913_v21 = vpop.permute.xlu2 %912 }
 0x4b4   : > { %916 = vst.msk [vmem:[#allocation5] sm:$0xff] %vm915_vm8, %v913_v21 }
 0x4c0   : > { %v983_v22 = vpop.permute.xlu2 %982 }
 0x4c1   : > { %986 = vst.msk [vmem:[#allocation5] sm:$0xff] %vm985_vm9, %v983_v22 }
 0x4eb   : > { %v1053_v25 = vpop.permute.xlu0 %1052 }
 0x4ec   : > { %1056 = vst.msk [vmem:[#allocation5] sm:$0xff] %vm1055_vm10, %v1053_v25 }
 0x4f3   : > { %v1057_v26 = vld [vmem:[#allocation5] sm:$0xff] }
 0x4f4   : > { %v1058_v27 = vpack.c.bf16 %v1057_v26, %v1057_v26 }
 0x4f6   : > { %1460 = vmatmul.msk.bf16.vlgmr.msra.gmra.mxu3 %vm631_vm0, %v1058_v27 }
 0x579   : > { %v1091_v29 = vpop.f32.mrf.mxu3 }
 0x57a   : > { %v1092_v30 = vadd.f32 %v1616_v28, %v1091_v29 }
 0x57c   : > { %v2149_v31 = vadd.f32 %v1092_v30, %v2070_v0 }
 0x57e   : > { %v1098_v32 = vsel %vm631_vm0, %v2149_v31, 0.0 }
 0x57f   : > { %1099 = vadd.xlane.f32.xlu1 %v1098_v32 }
 0x581   : > { %v1093_v33 = vpop.f32.mrf.mxu3 }
 0x5f2   : > { %v1100_v34 = vpop.xlane.xlu1 %1099 }
 0x5f3   : > { %v1108_v35 = vmul.f32 %v1100_v34, %v2074_v8 }
 0x5f5   : > { %v1109_v36 = vsub.f32 %v2149_v31, %v1108_v35 }
 0x5f7   : > { %v1110_v37 = vmul.f32 %v1109_v36, %v1109_v36 }
 0x5f9   : > { %v1111_v38 = vsel %vm631_vm0, %v1110_v37, 0.0 }
 0x5fa   : > { %1112 = vadd.xlane.f32.xlu2 %v1111_v38 }
 0x66d   : > { %v1113_v0 = vpop.xlane.xlu2 %1112 }
 0x66e   : > { %v1114_v41 = vmul.f32 %v1113_v0, %v2074_v8  ;;  %v1618_v8 = vld [vmem:[%s2233_s12] ss:$0 sm:$0xff] }
 0x670   : > { %v1115_v42 = vadd.f32 1e-06, %v1114_v41  ;;  %v1620_v41 = vld [vmem:[%s2278_s28] ss:$0 sm:$0xff] }
 0x672   : > { %1641 = vrsqrt.f32 %v1115_v42  ;;  %vm1122_vm12 = vweird.f32 %v1115_v42 }
 0x678   : > { %v1642_v43 = vpop.eup %1641 }
 0x679   : > { %v1117_v44 = vmul.f32 %v1642_v43, %v1115_v42  ;;  %vm1123_vm11 = vweird.f32 %v1642_v43 }
 0x67a   : > { %vm1124_vm13 = vmor %vm1122_vm12, %vm1123_vm11 }
 0x67b   : > { %v1118_v45 = vmul.f32 %v1642_v43, %v1117_v44 }
 0x67d   : > { %v1119_v46 = vmul.f32 0.5, %v1118_v45 }
 0x67f   : > { %v1120_v47 = vsub.f32 1.5, %v1119_v46 }
 0x681   : > { %v1121_v48 = vmul.f32 %v1642_v43, %v1120_v47 }
 0x683   : > { %v1125_v50 = vsel %vm1124_vm13, %v1642_v43, %v1121_v48 }
 0x684   : > { %v1126_v51 = vmul.f32 %v1125_v50, %v1109_v36 }
 0x686   : > { %v1130_v52 = vmul.f32 %v1617_v49, %v1126_v51 }
 0x688   : > { %v1134_v53 = vadd.f32 %v1618_v8, %v1130_v52 }
 0x68a   : > { %v1135_v54 = vpack.c.bf16 %v1134_v53, %v1134_v53 }
 0x68c   : > { %1469 = vmatmul.msk.bf16.vlgmr.msrb.gmra.mxu0 %vm631_vm0, %v1135_v54 }
 0x709   : > { %v1168_v56 = vpop.f32.mrf.mxu0 }
 0x70a   : > { %v1169_v57 = vadd.f32 %v1619_v55, %v1168_v56 }
 0x70c   : > { %v1173_v58 = vmul.f32 0.70710677, %v1169_v57  ;;  %v1172_v38 = vmul.f32 0.5, %v1169_v57 }
 0x70e   : > { %v1174_v59 = vmul.f32 %v1173_v58, %v1173_v58 }
 0x710   : > { %v1175_v60 = vmin.f32 %v1174_v59, 16.0 }
 0x711   : > { %v1170_v61 = vpop.f32.mrf.mxu0 }
 0x712   : > { %v1176_v62 = vmul.f32 2.1237322e-06, %v1175_v60  ;;  %v1187_v63 = vmul.f32 3.8918573e-05, %v1175_v60 }
 0x714   : > { %v1177_v2 = vadd.f32 0.00028619796, %v1176_v62  ;;  %v1188_v3 = vadd.f32 0.001143296, %v1187_v63 }
 0x716   : > { %v1178_v4 = vmul.f32 %v1177_v2, %v1175_v60  ;;  %v1189_v5 = vmul.f32 %v1188_v3, %v1175_v60 }
 0x718   : > { %v1190_v7 = vadd.f32 0.014752088, %v1189_v5  ;;  %v1179_v9 = vadd.f32 0.0036580483, %v1178_v4 }
 0x71a   : > { %v1191_v10 = vmul.f32 %v1190_v7, %v1175_v60  ;;  %v1180_v13 = vmul.f32 %v1179_v9, %v1175_v60 }
 0x71c   : > { %v1192_v12 = vadd.f32 0.112945676, %v1191_v10  ;;  %v1181_v17 = vadd.f32 0.05243302, %v1180_v13 }
 0x71e   : > { %v1193_v14 = vmul.f32 %v1192_v12, %v1175_v60  ;;  %v1182_v20 = vmul.f32 %v1181_v17, %v1175_v60 }
 0x720   : > { %v1194_v16 = vadd.f32 0.4994258, %v1193_v14  ;;  %v1183_v21 = vadd.f32 0.18741608, %v1182_v20 }
 0x722   : > { %v1195_v18 = vmul.f32 %v1194_v16, %v1175_v60  ;;  %v1184_v23 = vmul.f32 %v1183_v21, %v1175_v60 }
 0x724   : > { %v1196_v19 = vadd.f32 1.0, %v1195_v18  ;;  %v1185_v27 = vadd.f32 1.1283791, %v1184_v23 }
 0x726   : > { %1643 = vrcp.f32 %v1196_v19  ;;  %v1208_v26 = vand.u32 2147483648, %v1196_v19  ;;  %v1206_v29 = vand.u32 2147483647, %v1196_v19  ;;  %vm1202_vm15 = vweird.f32 %v1196_v19 }
 0x727   : > { %v1186_v33 = vmul.f32 %v1185_v27, %v1173_v58 }
 0x728   : > { %v1209_v32 = vor.u32 1.1754944e-38, %v1208_v26  ;;  %vm1207_vm2 = vcmp.eq.f32.partialorder %v1206_v29, 8.507059e+37 }
 0x72c   : > { %v1644_v22 = vpop.eup %1643 }
 0x72d   : > { %v1198_v24 = vmul.f32 %v1644_v22, %v1196_v19  ;;  %vm1203_vm14 = vweird.f32 %v1644_v22 }
 0x72e   : > { %vm1204_vm1 = vmor %vm1202_vm15, %vm1203_vm14 }
 0x72f   : > { %v1199_v25 = vsub.f32 1.0, %v1198_v24 }
 0x731   : > { %v1200_v28 = vmul.f32 %v1644_v22, %v1199_v25 }
 0x733   : > { %v1201_v30 = vadd.f32 %v1644_v22, %v1200_v28 }
 0x735   : > { %v1205_v34 = vsel %vm1204_vm1, %v1644_v22, %v1201_v30 }
 0x736   : > { %v1210_v35 = vsel %vm1207_vm2, %v1209_v32, %v1205_v34 }
 0x737   : > { %v1211_v36 = vmul.f32 %v1210_v35, %v1186_v33 }
 0x739   : > { %v1470_v37 = vclamps-f32 %v1211_v36, 1.0 }
 0x73b   : > { %v1214_v39 = vadd.f32 1.0, %v1470_v37 }
 0x73d   : > { %v1215_v40 = vmul.f32 %v1214_v39, %v1172_v38 }
 0x73f   : > { %v1216_v0 = vpack.c.bf16 %v1215_v40, %v1215_v40 }
 0x741   : > { %1487 = vmatmul.msk.bf16.vlgmr.msrb.gmra.mxu1 %vm1253_vm3, %v1216_v0 }
 0x7be   : > { %v1266_v42 = vpop.f32.mrf.mxu1 }
 0x7bf   : > { %v1267_v43 = vadd.f32 %v1620_v41, %v1266_v42 }
 0x7c1   : > { %v1270_v44 = vadd.f32 %v1267_v43, %v2149_v31 }
 0x7c3   : > { %1271 = vst.msk [vmem:[%s618_s16] sm:$0xff] %vm631_vm0, %v1270_v44 }
 0x7c4   : > { %1792 = shalt.err (!%p1789_p9)
}
 0x7c5   : > { %1522 = dma.vmem_to_hbm [thread:$0]  (%p2000_p4), %s1287_s17, 128, %s1289_s25, %s1273_s27  }
 0x7c6   : > { %v1268_v31 = vpop.f32.mrf.mxu1 }
 0x7c7 PF: > { %s2281_s21 = sld [smem:[#allocation23_spill]] }
 0x7c8   : > { %s2282_s30 = sld [smem:[#allocation19_spill]] }
 0x7cd   : > { %p1549_p10 = scmp.ge.s32.totalorder %s2281_s21, 2 }
 0x7ce   : > { %s1300_s20 = sand.u32 1, %s2282_s30  }
 0x7cf   : > { %p1538_p11 = pnand %p1549_p10, %p2007_p8  ;;  %s1301_s19 = scalar_lea.sflag [#allocation8], %s1300_s20 }
 0x7d1   : > { %p1539_p12 = pneg %p1538_p11 }
 0x7d3   : > { %1830 = dma.done.wait (%p1539_p12), %s1301_s19, 128  }
 0x7d4   : > { %1832 = vsyncadd (%p1539_p12), %s1301_s19, 4294967168  ;;  %s33_s29 = sadd.s32 1, %s2281_s21   ;;  %s2284_s24 = sld [smem:[#allocation20_spill]] }
 0x7d5   : > { %p30_p13 = scmp.ge.s32.totalorder %s33_s29, 4   ;;  %s2285_s25 = sld [smem:[#allocation21_spill]] }
 0x7d6   : > { %s2286_s26 = sld [smem:[#allocation27_spill]] }
 0x7d7   : > { %s2287_s27 = sld [smem:[#allocation22_spill]]  ;;  %32 = sbr.rel (!%p30_p13) target bundleno = 15 (0xf), region = 146 }
 0x7d8   : > { %s2288_s28 = sld [smem:[#allocation24_spill]] }
 0x7dc   :  { %1307 = vsyncpa [#allocation7], 1 }
 0x7dd   :  { %1309 = vsyncpa [#allocation7 + $0x1], 1 }
 0x7de   :  { %1310 = vsyncpa [#allocation10], 1 }
 0x7df   :  { %1311 = vsyncpa [#allocation13], 1 }
 0x7e0   :  { %1312 = vsyncpa [#allocation8], 1 }
 0x7e1   :  { %1314 = vsyncpa [#allocation8 + $0x1], 1 }

// kernel: tpu_custom_call.1
= control target key start
LH: loop header
LB: loop body
LE: loop exit
PB: predicated region body
PF: predicated region fallthrough
CT: control target
= control target key end

     0   :  { %s2221_s0 = inlined_call_operand.vmem [shape: f32[2,8,32], index: 0, kind: input, shape index: {}]   ;;  %s2222_s1 = inlined_call_operand.hbm [shape: f32[1,32], index: 1, kind: input, shape index: {}]   ;;  %s2223_s2 = inlined_call_operand.vmem [shape: f32[1,32], index: 2, kind: input, shape index: {}]   ;;  %s2224_s3 = inlined_call_operand.vmem [shape: bf16[32,32], index: 3, kind: input, shape index: {}]   ;;  %s2225_s4 = inlined_call_operand.vmem [shape: f32[1,32], index: 4, kind: input, shape index: {}]   ;;  %s2226_s5 = inlined_call_operand.vmem [shape: bf16[32,32], index: 5, kind: input, shape index: {}]   ;;  %s2227_s6 = inlined_call_operand.vmem [shape: f32[1,32], index: 6, kind: input, shape index: {}]   ;;  %s2228_s7 = inlined_call_operand.hbm [shape: bf16[32,32], index: 7, kind: input, shape index: {}]   ;;  %s2229_s8 = inlined_call_operand.vmem [shape: f32[1,32], index: 8, kind: input, shape index: {}]   ;;  %s2230_s9 = inlined_call_operand.hbm [shape: bf16[32,32], index: 9, kind: input, shape index: {}]   ;;  %s2231_s10 = inlined_call_operand.vmem [shape: f32[1,32], index: 10, kind: input, shape index: {}]   ;;  %s2232_s11 = inlined_call_operand.vmem [shape: f32[1,32], index: 11, kind: input, shape index: {}]   ;;  %s2233_s12 = inlined_call_operand.vmem [shape: f32[1,32], index: 12, kind: input, shape index: {}]   ;;  %s2234_s13 = inlined_call_operand.hbm [shape: bf16[32,64], index: 13, kind: input, shape index: {}]   ;;  %s2235_s14 = inlined_call_operand.vmem [shape: f32[1,64], index: 14, kind: input, shape index: {}]   ;;  %s2236_s15 = inlined_call_operand.vmem [shape: bf16[64,32], index: 15, kind: input, shape index: {}]   ;;  %s2237_s16 = inlined_call_operand.vmem [shape: f32[1,32], index: 16, kind: input, shape index: {}]   ;;  %s2238_s17 = inlined_call_operand.hbm [shape: f32[2,8,32], index: 17, kind: output, shape index: {}]  }
   0x1   :  { %2251 = sst [smem:[#allocation28_spill]] %s2221_s0 }
   0x2   :  { %2252 = sst [smem:[#allocation29_spill]] %s2222_s1 }
   0x3   :  { %2253 = sst [smem:[#allocation30_spill]] %s2228_s7 }
   0x4   :  { %2254 = sst [smem:[#allocation31_spill]] %s2235_s14 }
   0x5   :  { %2255 = sst [smem:[#allocation32_spill]] %s2236_s15 }
   0x6   :  { %2256 = sst [smem:[#allocation33_spill]] %s2237_s16 }
   0x7   :  { %2257 = sst [smem:[#allocation34_spill]] %s2238_s17 }
   0x8   :  { %22 = vsyncpa [#allocation7], 0 }
   0x9   :  { %23 = vsyncpa [#allocation10], 0 }
   0xa   :  { %24 = vsyncpa [#allocation13], 0 }
   0xb   :  { %25 = vsyncpa [#allocation8], 0 }
   0xc   :  { %27 = vsyncpa [#allocation8 + $0x1], 0  ;;  %s1960_s24 = smov 0   ;;  %s1962_s25 = smov 0  }
   0xd   :  { %s1964_s26 = smov 0   ;;  %s1966_s27 = smov 0  }
   0xe   :  { %s1968_s28 = smov 0   ;;  %s1970_s29 = smov 0  }
   0xf LB: > { %2258 = sst [smem:[#allocation19_spill]] %s1835_s24  ;;  %s1402_s0 = sadd.s32 4294967295, %s1855_s29   ;;  %s1855_s29 = sphi %s1970_s29, %s33_s29   ;;  %s1851_s28 = sphi %s1968_s28, %s2288_s28   ;;  %s1847_s27 = sphi %s1966_s27, %s2287_s27   ;;  %s1843_s26 = sphi %s1964_s26, %s2286_s26   ;;  %s1839_s25 = sphi %s1962_s25, %s2285_s25   ;;  %s1835_s24 = sphi %s1960_s24, %s2284_s24  }
  0x10   : > { %2259 = sst [smem:[#allocation20_spill]] %s1839_s25  ;;  %s1403_s30 = sadd.s32 4294967294, %s1855_s29  }
  0x11   : > { %2260 = sst [smem:[#allocation21_spill]] %s1843_s26  ;;  %s45_s18 = sadd.s32 1, %s1851_s28 }
  0x12   : > { %2261 = sst [smem:[#allocation22_spill]] %s1851_s28  ;;  %s416_s19 = sadd.s32 1, %s1843_s26 }
  0x13   : > { %2262 = sst [smem:[#allocation23_spill]] %s1855_s29  ;;  %p47_p0 = scmp.ge.s32.totalorder %s45_s18, 2 }
  0x14   : > { %p426_p1 = scmp.ne.s32.totalorder %s1843_s26, %s1839_s25  ;;  %p427_p2 = scmp.eq.s32.totalorder %s1402_s0, 1 }
  0x15   : > { %p432_p3 = scmp.ne.s32.totalorder %s1839_s25, %s1835_s24  ;;  %s2290_s18 = smov (%p47_p0, %s45_s18), 0 }
  0x16   : > { %2263 = sst [smem:[#allocation24_spill]] %s2290_s18  ;;  %p2000_p4 = por %p427_p2, %p426_p1 }
  0x17   : > { %p433_p5 = scmp.eq.s32.totalorder %s1403_s30, 1  ;;  %s411_s20 = ssub.s32 %s1851_s28, %s2290_s18 }
  0x18   : > { %s2264_s1 = scalar_select %p2000_p4, 1, 0 }
  0x19   : > { %p1404_p6 = scmp.ge.s32.totalorder %s1855_s29, 1  ;;  %p414_p7 = scmp.eq.s32.totalorder %s411_s20, 0 }
  0x1a   : > { %2265 = sst [smem:[#allocation25_spill]] %s2264_s1  ;;  %p2007_p8 = por %p433_p5, %p432_p3 }
  0x1b   : > { %p440_p9 = scmp.lt.s32.totalorder %s1855_s29, 3  ;;  %p2019_p11 = scmp.eq.s32.totalorder %s1402_s0, 0 }
  0x1c   : > { %s2266_s21 = scalar_select %p2007_p8, 1, 0 }
  0x1d   : > { %s2013_s22 = scalar_select %p414_p7, %s1843_s26, %s416_s19  }
  0x1e   : > { %2267 = sst [smem:[#allocation26_spill]] %s2266_s21  ;;  %p2015_p10 = pnand %p1404_p6, %p440_p9 }
  0x1f   : > { %2268 = sst [smem:[#allocation27_spill]] %s2013_s22  ;;  %s1857_s28 = smov [#allocation9]  }
  0x20   : > { %s2271_s7 = sld [smem:[#allocation30_spill]]  ;;  %p1524_p12 = pneg %p2015_p10 }
  0x21   : > { %s480_s19 = sshll.u32 %s1857_s28, 4  ;;  %s1858_s0 = smov 64   ;;  %s481_s19 = int_to_ptr.vmem [resolvable:$true] %s480_s19 }
  0x22   : > { %p2030_p13 = pnand %p2019_p11, %p1524_p12  ;;  %s1859_s26 = smov 4  }
  0x23   : > { %s1860_s28 = smov [#allocation6]   ;;  %s495_s16 = sshll.u32 %s2230_s9, 4  ;;  %s496_s16 = int_to_ptr.hbm [resolvable:$true] %s495_s16 }
  0x24   : > { %s454_s29 = sshll.u32 %s1860_s28, 4  ;;  %s1861_s25 = smov [#allocation11]   ;;  %s455_s29 = int_to_ptr.vmem [resolvable:$true] %s454_s29 }
  0x25   : > { %s497_s15 = sshll.u32 %s1861_s25, 4  ;;  %s498_s15 = int_to_ptr.vmem [resolvable:$true] %s497_s15 }
  0x26   : > { %s478_s20 = sshll.u32 %s2271_s7, 4  ;;  %s2273_s7 = sld [smem:[#allocation29_spill]]  ;;  %s479_s20 = int_to_ptr.hbm [resolvable:$true] %s478_s20 }
  0x27   : > { %1530 = dma.hbm_to_vmem [thread:$0]  (!%p2030_p13), %s479_s20, 256, %s481_s19, [#allocation10], %s1858_s0, %s1858_s0, %s1859_s26  }
  0x28   : > { %s518_s19 = sshll.u32 %s2234_s13, 4  ;;  %s519_s19 = int_to_ptr.hbm [resolvable:$true] %s518_s19 }
  0x29   : > { %1533 = dma.hbm_to_vmem [thread:$0]  (!%p2030_p13), %s496_s16, 256, %s498_s15, [#allocation10], %s1858_s0, %s1858_s0, %s1859_s26  }
  0x2b   : > { %552 = sbr.rel (%p2015_p10) target bundleno = 1991 (0x7c7), region = 88 }
  0x2c   : > { %s452_s21 = sshll.u32 %s2273_s7, 4  ;;  %s1862_s7 = smov [#allocation12]   ;;  %s453_s21 = int_to_ptr.hbm [resolvable:$true] %s452_s21 }
  0x2d   : > { %1527 = dma.hbm_to_vmem [thread:$0]  (!%p2030_p13), %s453_s21, 16, %s455_s29, [#allocation7]  }
  0x2e   : > { %s520_s18 = sshll.u32 %s1862_s7, 4  ;;  %s521_s18 = int_to_ptr.vmem [resolvable:$true] %s520_s18 }
  0x2f   : > { %1536 = dma.hbm_to_vmem [thread:$0]  (!%p2030_p13), %s519_s19, 256, %s521_s18, [#allocation13], %s1858_s0, %s1858_s0, %s1859_s26  }
  0x30   : > { %1818 = dma.done.wait (%p2019_p11), [#allocation7], 16  }
  0x31   : > { %1820 = vsyncadd (%p2019_p11), [#allocation7], 4294967280 }
  0x32   : > { %1822 = dma.done.wait (%p2019_p11), [#allocation10], 512  }
  0x33   : > { %1824 = vsyncadd (%p2019_p11), [#allocation10], 4294966784 }
  0x34   : > { %1826 = dma.done.wait (%p2019_p11), [#allocation13], 256  }
  0x35   : > { %1828 = vsyncadd (%p2019_p11), [#allocation13], 4294967040  ;;  %p619_p0 = scmp.lt.s32.totalorder %s1847_s27, 1  ;;  %s2274_s25 = sld [smem:[#allocation28_spill]]  ;;  %vm631_vm0 = vcmask 261120   ;;  %v1863_v2 = vmov 32.0  }
  0x36   : > { %1621 = vrcp.f32 %v1863_v2  ;;  %v1493_v14 = vld [vmem:[%s2226_s5 + $0x8] sm:$0xff]  ;;  %v1495_v15 = vld [vmem:[#allocation9 + $0x8] sm:$0xff]  ;;  %v1494_v17 = vld [vmem:[#allocation9] sm:$0xff]  ;;  %vm670_vm5 = vcmask 257024   ;;  %vm793_vm6 = vcmask 64512   ;;  %vm828_vm7 = vcmask 1043456  }
  0x37   : > { %s620_s14 = scalar_select %p619_p0, %s1847_s27, 1  ;;  %701 = vmatpush.bf16.msra.mxu0 %v1493_v14  ;;  %736 = vmatpush.bf16.msra.mxu1 %v1495_v15  ;;  %v1492_v16 = vld [vmem:[%s2226_s5] sm:$0xff]  ;;  %v1497_v18 = vld [vmem:[%s2224_s3 + $0x8] sm:$0xff]  ;;  %v1611_v29 = vld [vmem:[#allocation6] ss:$0 sm:$0xff]  ;;  %vm915_vm8 = vcmask 130112  }
  0x38   : > { %783 = vmatpush.bf16.msra.mxu2 %v1497_v18  ;;  %v1496_v20 = vld [vmem:[%s2224_s3] sm:$0xff]  ;;  %s1864_s17 = smov 112   ;;  %s1867_s24 = smov 8   ;;  %vm985_vm9 = vcmask 195712   ;;  %vm1055_vm10 = vcmask 261312  }
  0x39   : > { %s1416_s15 = sshll.u32 %s620_s14, 3  ;;  %v1612_v32 = vld [vmem:[%s2223_s2] ss:$0 sm:$0xff]  ;;  %s1868_s29 = smov 16  }
  0x3a   : > { %v1613_v37 = vld [vmem:[%s2227_s6] ss:$0 sm:$0xff]  ;;  %s1869_s1 = smov 24   ;;  %s2275_s7 = sld [smem:[#allocation31_spill]] }
  0x3b   : > { %s622_s26 = scalar_lea.vmem %s2274_s25, %s1416_s15  ;;  %702 = vmatpush.bf16.msra.mxu0 %v1492_v16  ;;  %737 = vmatpush.bf16.msra.mxu1 %v1494_v17  ;;  %v1614_v38 = vld [vmem:[%s2229_s8] ss:$0 sm:$0xff]  ;;  %s1865_s25 = smov 120  }
  0x3c   : > { %v2070_v0 = vld [vmem:[%s622_s26] sm:$0xff]  ;;  %v1622_v3 = vpop.eup %1621  ;;  %784 = vmatpush.bf16.msra.mxu2 %v1496_v20  ;;  %s1866_s26 = smov 104   ;;  %s2276_s15 = sld [smem:[#allocation32_spill]] }
  0x3d   : > { %v632_v1 = vsel %vm631_vm0, %v2070_v0, 0.0  ;;  %v636_v4 = vmul.f32 32.0, %v1622_v3  ;;  %vm640_vm1 = vweird.f32 %v1622_v3  ;;  %v1615_v47 = vld [vmem:[%s2225_s4] ss:$0 sm:$0xff]  ;;  %s1489_s23 = sshll.u32 %s1847_s27, 3  ;;  %s2278_s28 = sld [smem:[#allocation33_spill]] }
  0x3e   : > { %633 = vadd.xlane.f32.xlu0 %v632_v1 }
  0x3f   : > { %v637_v5 = vsub.f32 1.0, %v636_v4 }
  0x41   : > { %v638_v6 = vmul.f32 %v1622_v3, %v637_v5 }
  0x43   : > { %v639_v7 = vadd.f32 %v1622_v3, %v638_v6 }
  0x45   : > { %v2074_v8 = vsel %vm640_vm1, %v1622_v3, %v639_v7 }
  0xb1   : > { %v634_v9 = vpop.xlane.xlu0 %633 }
  0xb2   : > { %v642_v10 = vmul.f32 %v2074_v8, %v634_v9 }
  0xb4   : > { %v643_v11 = vsub.f32 %v2070_v0, %v642_v10 }
  0xb6   : > { %v644_v12 = vmul.f32 %v643_v11, %v643_v11 }
  0xb8   : > { %v645_v13 = vsel %vm631_vm0, %v644_v12, 0.0 }
  0xb9   : > { %646 = vadd.xlane.f32.xlu0 %v645_v13 }
 0x12c   : > { %v647_v19 = vpop.xlane.xlu0 %646 }
 0x12d   : > { %v648_v21 = vmul.f32 %v647_v19, %v2074_v8 }
 0x12f   : > { %v649_v22 = vadd.f32 1e-06, %v648_v21 }
 0x131   : > { %1623 = vrsqrt.f32 %v649_v22  ;;  %vm656_vm3 = vweird.f32 %v649_v22 }
 0x137   : > { %v1624_v23 = vpop.eup %1623 }
 0x138   : > { %v651_v24 = vmul.f32 %v1624_v23, %v649_v22  ;;  %vm657_vm2 = vweird.f32 %v1624_v23 }
 0x139   : > { %vm658_vm4 = vmor %vm656_vm3, %vm657_vm2  ;;  %vm1253_vm3 = vcmask 523264  }
 0x13a   : > { %v652_v25 = vmul.f32 %v1624_v23, %v651_v24 }
 0x13c   : > { %v653_v26 = vmul.f32 0.5, %v652_v25 }
 0x13e   : > { %v654_v27 = vsub.f32 1.5, %v653_v26 }
 0x140   : > { %v655_v28 = vmul.f32 %v1624_v23, %v654_v27 }
 0x142   : > { %v659_v30 = vsel %vm658_vm4, %v1624_v23, %v655_v28 }
 0x143   : > { %v660_v31 = vmul.f32 %v659_v30, %v643_v11 }
 0x145   : > { %v664_v33 = vmul.f32 %v1611_v29, %v660_v31 }
 0x147   : > { %v668_v34 = vadd.f32 %v1612_v32, %v664_v33 }
 0x149   : > { %v669_v35 = vpack.c.bf16 %v668_v34, %v668_v34 }
 0x14b   : > { %671 = vst.msk [vmem:[#allocation2] sm:$0xf] %vm670_vm5, %v669_v35  ;;  %1425 = vmatmul.msk.bf16.vlgmr.msra.gmra.mxu0 %vm631_vm0, %v669_v35  ;;  %1434 = vmatmul.msk.bf16.vlgmr.msra.gmra.mxu1 %vm631_vm0, %v669_v35 }
 0x152   : > { %v752_v36 = vld [vmem:[#allocation2] sm:$0xf] }
 0x153   : > { %1443 = vmatmul.msk.bf16.vlgmr.msra.gmra.mxu2 %vm631_vm0, %v752_v36 }
 0x1c8   : > { %v704_v39 = vpop.f32.mrf.mxu0  ;;  %v739_v40 = vpop.f32.mrf.mxu1 }
 0x1c9   : > { %v705_v41 = vadd.f32 %v1613_v37, %v704_v39  ;;  %v740_v42 = vadd.f32 %v1614_v38, %v739_v40 }
 0x1cb   : > { %v708_v43 = vpack.c.bf16 %v705_v41, %v705_v41  ;;  %v743_v44 = vpack.c.bf16 %v740_v42, %v740_v42 }
 0x1cd   : > { %709 = vst.msk [vmem:[#allocation3] sm:$0xf] %vm670_vm5, %v708_v43 }
 0x1ce   : > { %744 = vst.msk [vmem:[#allocation4] sm:$0xf] %vm670_vm5, %v743_v44 }
 0x1d0   : > { %v706_v45 = vpop.f32.mrf.mxu0  ;;  %v741_v46 = vpop.f32.mrf.mxu1 }
 0x1d4   : > { %v791_v48 = vld [vmem:[#allocation3] sm:$0xf] }
 0x1d5   : > { %v917_v49 = vld [vmem:[#allocation3] sm:$0xf]  ;;  %v798_v51 = vsel %vm793_vm6, %v791_v48, 0  ;;  %v792_v52 = vld [vmem:[#allocation4] sm:$0xf] }
 0x1d6   : > { %v846_v50 = vld [vmem:[#allocation3] sm:$0xf]  ;;  %v922_v53 = vunpack.c.l.b16 %v917_v49  ;;  %v786_v55 = vpop.f32.mrf.mxu2  ;;  %807 = vmatpush.bf16.xpose.msra.mxu3 %v798_v51  ;;  %v830_v56 = vsel %vm828_vm7, %v792_v52, 0  ;;  %v847_v48 = vld [vmem:[#allocation4] sm:$0xf] }
 0x1d7   : > { %v852_v54 = vunpack.c.l.b16 %v846_v50  ;;  %v787_v57 = vadd.f32 %v1615_v47, %v786_v55  ;;  %839 = vmatpush.bf16.msrb.mxu0 %v830_v56  ;;  %v987_v60 = vld [vmem:[#allocation3] sm:$0xf]  ;;  %v888_v49 = vunpack.c.l.b16 %v847_v48  ;;  %v918_v50 = vld [vmem:[#allocation4] sm:$0xf] }
 0x1d8   : > { %v923_v58 = vpack.c.b16 %v922_v53, %v922_v53  ;;  %v992_v62 = vunpack.c.l.b16 %v987_v60  ;;  %v958_v52 = vunpack.c.l.b16 %v918_v50 }
 0x1d9   : > { %v853_v59 = vpack.c.b16 %v852_v54, %v852_v54  ;;  %v790_v61 = vpack.c.bf16 %v787_v57, %v787_v57  ;;  %v889_v51 = vpack.c.b16 %v888_v49, %v888_v49  ;;  %v988_v54 = vld [vmem:[#allocation4] sm:$0xf]  ;;  %v1617_v49 = vld [vmem:[%s2232_s11] ss:$0 sm:$0xff] }
 0x1da   : > { %924 = vrot.lane.b32.xlu2 %v923_v58, %s1864_s17  ;;  %v993_v1 = vpack.c.b16 %v992_v62, %v992_v62  ;;  %v959_v53 = vpack.c.b16 %v958_v52, %v958_v52  ;;  %v1028_v55 = vunpack.c.l.b16 %v988_v54 }
 0x1db   : > { %854 = vrot.lane.b32.xlu1 %v853_v59, %s1865_s25  ;;  %919 = vrot.lane.b32.xlu0 %v790_v61, %s1864_s17 }
 0x1dc   : > { %v1029_v56 = vpack.c.b16 %v1028_v55, %v1028_v55  ;;  %v1619_v55 = vld [vmem:[%s2275_s7] ss:$0 sm:$0xff]  ;;  %s2279_s7 = sld [smem:[#allocation34_spill]] }
 0x1dd   : > { %1444 = vmatmul.msk.bf16.vlgmr.msra.gmra.mxu3 %vm793_vm6, %v790_v61 }
 0x1de   : > { %v788_v63 = vpop.f32.mrf.mxu2 }
 0x1e2   : > { %994 = vrot.lane.b32.xlu2 %v993_v1, %s1866_s26  ;;  %s1284_s14 = scalar_lea.hbm %s2279_s7, %s1489_s23 }
 0x1e3   : > { %849 = vrot.lane.b32.xlu1 %v790_v61, %s1865_s25 }
 0x1eb   : > { %989 = vrot.lane.b32.xlu1 %v790_v61, %s1866_s26 }
 0x234   : > { %v925_v2 = vpop.permute.xlu2 %924 }
 0x235   : > { %v930_v3 = vsel %vm793_vm6, %v925_v2, 0 }
 0x236   : > { %939 = vmatpush.bf16.xpose.msrb.mxu3 %v930_v3 }
 0x23c   : > { %v995_v4 = vpop.permute.xlu2 %994 }
 0x23d   : > { %v1000_v7 = vsel %vm793_vm6, %v995_v4, 0 }
 0x24d   : > { %v855_v5 = vpop.permute.xlu1 %854  ;;  %v920_v9 = vpop.permute.xlu0 %919 }
 0x24e   : > { %v860_v6 = vsel %vm793_vm6, %v855_v5, 0  ;;  %1448 = vmatmul.msk.bf16.vlgmr.msrb.gmra.mxu3 %vm793_vm6, %v920_v9 }
 0x24f   : > { %869 = vmatpush.bf16.xpose.msrb.mxu1 %v860_v6 }
 0x255   : > { %v850_v10 = vpop.permute.xlu1 %849 }
 0x256   : > { %1446 = vmatmul.msk.bf16.vlgmr.msrb.gmra.mxu1 %vm793_vm6, %v850_v10 }
 0x257   : > { %1009 = vmatpush.bf16.xpose.msra.mxu1 %v1000_v7 }
 0x25d   : > { %v990_v13 = vpop.permute.xlu1 %989 }
 0x260   : > { %v809_v11 = vpop.f32.mrf.mxu3 }
 0x261   : > { %v813_v12 = vsel %vm793_vm6, %v809_v11, -inf }
 0x262   : > { %814 = vmax.xlane.f32.xlu1 %v813_v12 }
 0x266   : > { %1450 = vmatmul.msk.bf16.vlgmr.msra.gmra.mxu1 %vm793_vm6, %v990_v13 }
 0x268   : > { %v811_v14 = vpop.f32.mrf.mxu3 }
 0x2d1   : > { %v941_v16 = vpop.f32.mrf.mxu3 }
 0x2d2   : > { %v945_v23 = vsel %vm793_vm6, %v941_v16, -inf }
 0x2d3   : > { %v871_v15 = vpop.f32.mrf.mxu1 }
 0x2d4   : > { %v875_v17 = vsel %vm793_vm6, %v871_v15, -inf }
 0x2d5   : > { %876 = vmax.xlane.f32.xlu2 %v875_v17  ;;  %v815_v18 = vpop.xlane.xlu1 %814 }
 0x2d6   : > { %v816_v19 = vsub.f32 %v809_v11, %v815_v18 }
 0x2d8   : > { %v817_v20 = vmul.f32 1.442695, %v816_v19 }
 0x2d9   : > { %v943_v22 = vpop.f32.mrf.mxu3 }
 0x2da   : > { %1625 = vpow2.f32 %v817_v20 }
 0x2db   : > { %v873_v21 = vpop.f32.mrf.mxu1 }
 0x2dd   : > { %946 = vmax.xlane.f32.xlu2 %v945_v23  ;;  %v1499_v23 = vld [vmem:[#allocation11 + $0x8] sm:$0xff] }
 0x2de   : > { %1088 = vmatpush.bf16.msra.mxu3 %v1499_v23 }
 0x2e0   : > { %v1626_v24 = vpop.eup %1625 }
 0x2e1   : > { %v819_v26 = vsel %vm793_vm6, %v1626_v24, 0.0 }
 0x2e2   : > { %820 = vadd.xlane.f32.xlu1 %v819_v26 }
 0x2e3   : > { %v1011_v25 = vpop.f32.mrf.mxu1 }
 0x2e4   : > { %v1015_v27 = vsel %vm793_vm6, %v1011_v25, -inf }
 0x2e5   : > { %1016 = vmax.xlane.f32.xlu0 %v1015_v27 }
 0x2eb   : > { %v1013_v28 = vpop.f32.mrf.mxu1 }
 0x2ec   : > { %v1616_v28 = vld [vmem:[%s2231_s10] ss:$0 sm:$0xff] }
 0x348   : > { %v877_v29 = vpop.xlane.xlu2 %876 }
 0x349   : > { %v878_v30 = vsub.f32 %v871_v15, %v877_v29 }
 0x34b   : > { %v879_v31 = vmul.f32 1.442695, %v878_v30 }
 0x34d   : > { %1627 = vpow2.f32 %v879_v31 }
 0x350   : > { %v947_v32 = vpop.xlane.xlu2 %946 }
 0x351   : > { %v948_v33 = vsub.f32 %v941_v16, %v947_v32 }
 0x353   : > { %v1628_v34 = vpop.eup %1627  ;;  %v949_v35 = vmul.f32 1.442695, %v948_v33 }
 0x354   : > { %v881_v36 = vsel %vm793_vm6, %v1628_v34, 0.0 }
 0x355   : > { %1629 = vpow2.f32 %v949_v35  ;;  %882 = vadd.xlane.f32.xlu2 %v881_v36  ;;  %v821_v37 = vpop.xlane.xlu1 %820 }
 0x356   : > { %1631 = vrcp.f32 %v821_v37 }
 0x358   : > { %v1017_v38 = vpop.xlane.xlu0 %1016 }
 0x359   : > { %v1018_v39 = vsub.f32 %v1011_v25, %v1017_v38 }
 0x35b   : > { %v1630_v40 = vpop.eup %1629  ;;  %v1019_v41 = vmul.f32 1.442695, %v1018_v39  ;;  %v1501_v39 = vld [vmem:[#allocation12 + $0x8] sm:$0xff] }
 0x35c   : > { %v951_v42 = vsel %vm793_vm6, %v1630_v40, 0.0  ;;  %v1632_v43 = vpop.eup %1631 }
 0x35d   : > { %1633 = vpow2.f32 %v1019_v41  ;;  %952 = vadd.xlane.f32.xlu0 %v951_v42  ;;  %v823_v44 = vmul.f32 %v1632_v43, %v1626_v24  ;;  %v1498_v24 = vld [vmem:[#allocation11] sm:$0xff] }
 0x35e   : > { %1089 = vmatpush.bf16.msra.mxu3 %v1498_v24 }
 0x35f   : > { %v824_v45 = vpack.c.bf16 %v823_v44, %v823_v44 }
 0x361   : > { %1445 = vmatmul.msk.bf16.vlgmr.msrb.gmra.mxu0 %vm793_vm6, %v824_v45 }
 0x363   : > { %v1634_v46 = vpop.eup %1633 }
 0x364   : > { %v1021_v47 = vsel %vm793_vm6, %v1634_v46, 0.0 }
 0x365   : > { %1022 = vadd.xlane.f32.xlu1 %v1021_v47 }
 0x36d   : > { %890 = vrot.lane.b32.xlu2 %v889_v51, %s1865_s25  ;;  %s1288_s25 = sshll.u32 %s1284_s14, 4  ;;  %s1289_s25 = int_to_ptr.hbm [resolvable:$true] %s1288_s25 }
 0x371   : > { %960 = vrot.lane.b32.xlu0 %v959_v53, %s1864_s17 }
 0x37e   : > { %1030 = vrot.lane.b32.xlu1 %v1029_v56, %s1866_s26  ;;  %s1779_s26 = sshra.s32 %s1289_s25, 4  ;;  %s1780_s26 = int_to_ptr.hbm [resolvable:$true] %s1779_s26 }
 0x37f   : > { %p1786_p5 = scmp.lt.s32.totalorder %s1780_s26, %s2279_s7 }
 0x3c8   : > { %v883_v57 = vpop.xlane.xlu2 %882 }
 0x3c9   : > { %1635 = vrcp.f32 %v883_v57 }
 0x3cf   : > { %v1636_v58 = vpop.eup %1635 }
 0x3d0   : > { %v885_v59 = vmul.f32 %v1636_v58, %v1628_v34  ;;  %v891_v60 = vpop.permute.xlu2 %890  ;;  %v953_v63 = vpop.xlane.xlu0 %952 }
 0x3d1   : > { %v896_v61 = vsel %vm828_vm7, %v891_v60, 0  ;;  %1637 = vrcp.f32 %v953_v63 }
 0x3d2   : > { %905 = vmatpush.bf16.msrb.mxu2 %v896_v61  ;;  %v886_v62 = vpack.c.bf16 %v885_v59, %v885_v59 }
 0x3d5   : > { %1447 = vmatmul.msk.bf16.vlgmr.msrb.gmra.mxu2 %vm793_vm6, %v886_v62 }
 0x3d7   : > { %v1638_v1 = vpop.eup %1637 }
 0x3d8   : > { %v955_v3 = vmul.f32 %v1638_v1, %v1630_v40  ;;  %v1023_v4 = vpop.xlane.xlu1 %1022  ;;  %v1500_v40 = vld [vmem:[#allocation12] sm:$0xff] }
 0x3d9   : > { %1639 = vrcp.f32 %v1023_v4  ;;  %v1505_v1 = vld [vmem:[%s2276_s15 + $0x18] sm:$0xff] }
 0x3da   : > { %v956_v7 = vpack.c.bf16 %v955_v3, %v955_v3  ;;  %1261 = vmatpush.bf16.msrb.mxu1 %v1505_v1 }
 0x3de   : > { %v841_v2 = vpop.f32.mrf.mxu0 }
 0x3df   : > { %845 = vst.msk [vmem:[#allocation5] sm:$0xff] %vm793_vm6, %v841_v2  ;;  %v1640_v10 = vpop.eup %1639 }
 0x3e0   : > { %v1025_v11 = vmul.f32 %v1640_v10, %v1634_v46 }
 0x3e2   : > { %v1026_v14 = vpack.c.bf16 %v1025_v11, %v1025_v11  ;;  %v1503_v11 = vld [vmem:[%s2276_s15 + $0x8] sm:$0xff] }
 0x3e3   : > { %v961_v5 = vpop.permute.xlu0 %960 }
 0x3e4   : > { %v966_v6 = vsel %vm828_vm7, %v961_v5, 0 }
 0x3e5   : > { %975 = vmatpush.bf16.msra.mxu0 %v966_v6  ;;  %v1504_v6 = vld [vmem:[%s2276_s15 + $0x10] sm:$0xff] }
 0x3e6   : > { %v843_v9 = vpop.f32.mrf.mxu0  ;;  %1262 = vmatpush.bf16.msrb.mxu1 %v1504_v6 }
 0x3e8   : > { %1449 = vmatmul.msk.bf16.vlgmr.msra.gmra.mxu0 %vm793_vm6, %v956_v7 }
 0x3e9   : > { %1165 = vmatpush.bf16.msrb.mxu0 %v1501_v39 }
 0x3ea   : > { %1263 = vmatpush.bf16.msrb.mxu1 %v1503_v11 }
 0x3ed   : > { %1166 = vmatpush.bf16.msrb.mxu0 %v1500_v40 }
 0x3f0   : > { %v1031_v12 = vpop.permute.xlu1 %1030 }
 0x3f1   : > { %v1036_v13 = vsel %vm828_vm7, %v1031_v12, 0 }
 0x3f2   : > { %1045 = vmatpush.bf16.msra.mxu2 %v1036_v13 }
 0x3f5   : > { %1451 = vmatmul.msk.bf16.vlgmr.msra.gmra.mxu2 %vm793_vm6, %v1026_v14 }
 0x458   : > { %v907_v15 = vpop.f32.mrf.mxu2 }
 0x459   : > { %912 = vrot.lane.b32.xlu2 %v907_v15, %s1867_s24  ;;  %v1502_v15 = vld [vmem:[%s2276_s15] sm:$0xff]  ;;  %s1781_s24 = scalar_lea.hbm %s1780_s26, 8 }
 0x45a   : > { %1264 = vmatpush.bf16.msrb.mxu1 %v1502_v15  ;;  %p1782_p1 = scmp.ne.s32.totalorder %s1780_s26, %s1781_s24 }
 0x45c   : > { %p1783_p2 = pnand %p1782_p1, %p2000_p4 }
 0x45e   : > { %p1784_p3 = pneg %p1783_p2 }
 0x460   : > { %v909_v16 = vpop.f32.mrf.mxu2 }
 0x465   : > { %v977_v17 = vpop.f32.mrf.mxu0 }
 0x466   : > { %982 = vrot.lane.b32.xlu2 %v977_v17, %s1868_s29 }
 0x46d   : > { %v979_v18 = vpop.f32.mrf.mxu0 }
 0x478   : > { %v1047_v19 = vpop.f32.mrf.mxu2 }
 0x479   : > { %1052 = vrot.lane.b32.xlu0 %v1047_v19, %s1869_s1  ;;  %s2277_s1 = sld [smem:[#allocation20_spill]] }
 0x47f   : > { %s616_s21 = sand.u32 1, %s2277_s1  }
 0x480   : > { %v1049_v20 = vpop.f32.mrf.mxu2  ;;  %s1415_s22 = sshll.u32 %s616_s21, 3  ;;  %s1273_s27 = scalar_lea.sflag [#allocation8], %s616_s21 }
 0x481   : > { %s618_s16 = scalar_lea.vmem [#allocation14], %s1415_s22  ;;  %s1785_s22 = scalar_lea.hbm %s2279_s7, 16 }
 0x482   : > { %s1286_s17 = sshll.u32 %s618_s16, 4  ;;  %p1787_p6 = scmp.lt.s32.totalorder %s1785_s22, %s1781_s24  ;;  %s1287_s17 = int_to_ptr.vmem [resolvable:$true] %s1286_s17 }
 0x484   : > { %p1788_p7 = por %p1787_p6, %p1786_p5 }
 0x486   : > { %p1789_p9 = pnand %p1788_p7, %p1784_p3 }
 0x4b3   : > { %v913_v21 = vpop.permute.xlu2 %912 }
 0x4b4   : > { %916 = vst.msk [vmem:[#allocation5] sm:$0xff] %vm915_vm8, %v913_v21 }
 0x4c0   : > { %v983_v22 = vpop.permute.xlu2 %982 }
 0x4c1   : > { %986 = vst.msk [vmem:[#allocation5] sm:$0xff] %vm985_vm9, %v983_v22 }
 0x4eb   : > { %v1053_v25 = vpop.permute.xlu0 %1052 }
 0x4ec   : > { %1056 = vst.msk [vmem:[#allocation5] sm:$0xff] %vm1055_vm10, %v1053_v25 }
 0x4f3   : > { %v1057_v26 = vld [vmem:[#allocation5] sm:$0xff] }
 0x4f4   : > { %v1058_v27 = vpack.c.bf16 %v1057_v26, %v1057_v26 }
 0x4f6   : > { %1460 = vmatmul.msk.bf16.vlgmr.msra.gmra.mxu3 %vm631_vm0, %v1058_v27 }
 0x579   : > { %v1091_v29 = vpop.f32.mrf.mxu3 }
 0x57a   : > { %v1092_v30 = vadd.f32 %v1616_v28, %v1091_v29 }
 0x57c   : > { %v2149_v31 = vadd.f32 %v1092_v30, %v2070_v0 }
 0x57e   : > { %v1098_v32 = vsel %vm631_vm0, %v2149_v31, 0.0 }
 0x57f   : > { %1099 = vadd.xlane.f32.xlu1 %v1098_v32 }
 0x581   : > { %v1093_v33 = vpop.f32.mrf.mxu3 }
 0x5f2   : > { %v1100_v34 = vpop.xlane.xlu1 %1099 }
 0x5f3   : > { %v1108_v35 = vmul.f32 %v1100_v34, %v2074_v8 }
 0x5f5   : > { %v1109_v36 = vsub.f32 %v2149_v31, %v1108_v35 }
 0x5f7   : > { %v1110_v37 = vmul.f32 %v1109_v36, %v1109_v36 }
 0x5f9   : > { %v1111_v38 = vsel %vm631_vm0, %v1110_v37, 0.0 }
 0x5fa   : > { %1112 = vadd.xlane.f32.xlu2 %v1111_v38 }
 0x66d   : > { %v1113_v0 = vpop.xlane.xlu2 %1112 }
 0x66e   : > { %v1114_v41 = vmul.f32 %v1113_v0, %v2074_v8  ;;  %v1618_v8 = vld [vmem:[%s2233_s12] ss:$0 sm:$0xff] }
 0x670   : > { %v1115_v42 = vadd.f32 1e-06, %v1114_v41  ;;  %v1620_v41 = vld [vmem:[%s2278_s28] ss:$0 sm:$0xff] }
 0x672   : > { %1641 = vrsqrt.f32 %v1115_v42  ;;  %vm1122_vm12 = vweird.f32 %v1115_v42 }
 0x678   : > { %v1642_v43 = vpop.eup %1641 }
 0x679   : > { %v1117_v44 = vmul.f32 %v1642_v43, %v1115_v42  ;;  %vm1123_vm11 = vweird.f32 %v1642_v43 }
 0x67a   : > { %vm1124_vm13 = vmor %vm1122_vm12, %vm1123_vm11 }
 0x67b   : > { %v1118_v45 = vmul.f32 %v1642_v43, %v1117_v44 }
 0x67d   : > { %v1119_v46 = vmul.f32 0.5, %v1118_v45 }
 0x67f   : > { %v1120_v47 = vsub.f32 1.5, %v1119_v46 }
 0x681   : > { %v1121_v48 = vmul.f32 %v1642_v43, %v1120_v47 }
 0x683   : > { %v1125_v50 = vsel %vm1124_vm13, %v1642_v43, %v1121_v48 }
 0x684   : > { %v1126_v51 = vmul.f32 %v1125_v50, %v1109_v36 }
 0x686   : > { %v1130_v52 = vmul.f32 %v1617_v49, %v1126_v51 }
 0x688   : > { %v1134_v53 = vadd.f32 %v1618_v8, %v1130_v52 }
 0x68a   : > { %v1135_v54 = vpack.c.bf16 %v1134_v53, %v1134_v53 }
 0x68c   : > { %1469 = vmatmul.msk.bf16.vlgmr.msrb.gmra.mxu0 %vm631_vm0, %v1135_v54 }
 0x709   : > { %v1168_v56 = vpop.f32.mrf.mxu0 }
 0x70a   : > { %v1169_v57 = vadd.f32 %v1619_v55, %v1168_v56 }
 0x70c   : > { %v1173_v58 = vmul.f32 0.70710677, %v1169_v57  ;;  %v1172_v38 = vmul.f32 0.5, %v1169_v57 }
 0x70e   : > { %v1174_v59 = vmul.f32 %v1173_v58, %v1173_v58 }
 0x710   : > { %v1175_v60 = vmin.f32 %v1174_v59, 16.0 }
 0x711   : > { %v1170_v61 = vpop.f32.mrf.mxu0 }
 0x712   : > { %v1176_v62 = vmul.f32 2.1237322e-06, %v1175_v60  ;;  %v1187_v63 = vmul.f32 3.8918573e-05, %v1175_v60 }
 0x714   : > { %v1177_v2 = vadd.f32 0.00028619796, %v1176_v62  ;;  %v1188_v3 = vadd.f32 0.001143296, %v1187_v63 }
 0x716   : > { %v1178_v4 = vmul.f32 %v1177_v2, %v1175_v60  ;;  %v1189_v5 = vmul.f32 %v1188_v3, %v1175_v60 }
 0x718   : > { %v1190_v7 = vadd.f32 0.014752088, %v1189_v5  ;;  %v1179_v9 = vadd.f32 0.0036580483, %v1178_v4 }
 0x71a   : > { %v1191_v10 = vmul.f32 %v1190_v7, %v1175_v60  ;;  %v1180_v13 = vmul.f32 %v1179_v9, %v1175_v60 }
 0x71c   : > { %v1192_v12 = vadd.f32 0.112945676, %v1191_v10  ;;  %v1181_v17 = vadd.f32 0.05243302, %v1180_v13 }
 0x71e   : > { %v1193_v14 = vmul.f32 %v1192_v12, %v1175_v60  ;;  %v1182_v20 = vmul.f32 %v1181_v17, %v1175_v60 }
 0x720   : > { %v1194_v16 = vadd.f32 0.4994258, %v1193_v14  ;;  %v1183_v21 = vadd.f32 0.18741608, %v1182_v20 }
 0x722   : > { %v1195_v18 = vmul.f32 %v1194_v16, %v1175_v60  ;;  %v1184_v23 = vmul.f32 %v1183_v21, %v1175_v60 }
 0x724   : > { %v1196_v19 = vadd.f32 1.0, %v1195_v18  ;;  %v1185_v27 = vadd.f32 1.1283791, %v1184_v23 }
 0x726   : > { %1643 = vrcp.f32 %v1196_v19  ;;  %v1208_v26 = vand.u32 2147483648, %v1196_v19  ;;  %v1206_v29 = vand.u32 2147483647, %v1196_v19  ;;  %vm1202_vm15 = vweird.f32 %v1196_v19 }
 0x727   : > { %v1186_v33 = vmul.f32 %v1185_v27, %v1173_v58 }
 0x728   : > { %v1209_v32 = vor.u32 1.1754944e-38, %v1208_v26  ;;  %vm1207_vm2 = vcmp.eq.f32.partialorder %v1206_v29, 8.507059e+37 }
 0x72c   : > { %v1644_v22 = vpop.eup %1643 }
 0x72d   : > { %v1198_v24 = vmul.f32 %v1644_v22, %v1196_v19  ;;  %vm1203_vm14 = vweird.f32 %v1644_v22 }
 0x72e   : > { %vm1204_vm1 = vmor %vm1202_vm15, %vm1203_vm14 }
 0x72f   : > { %v1199_v25 = vsub.f32 1.0, %v1198_v24 }
 0x731   : > { %v1200_v28 = vmul.f32 %v1644_v22, %v1199_v25 }
 0x733   : > { %v1201_v30 = vadd.f32 %v1644_v22, %v1200_v28 }
 0x735   : > { %v1205_v34 = vsel %vm1204_vm1, %v1644_v22, %v1201_v30 }
 0x736   : > { %v1210_v35 = vsel %vm1207_vm2, %v1209_v32, %v1205_v34 }
 0x737   : > { %v1211_v36 = vmul.f32 %v1210_v35, %v1186_v33 }
 0x739   : > { %v1470_v37 = vclamps-f32 %v1211_v36, 1.0 }
 0x73b   : > { %v1214_v39 = vadd.f32 1.0, %v1470_v37 }
 0x73d   : > { %v1215_v40 = vmul.f32 %v1214_v39, %v1172_v38 }
 0x73f   : > { %v1216_v0 = vpack.c.bf16 %v1215_v40, %v1215_v40 }
 0x741   : > { %1487 = vmatmul.msk.bf16.vlgmr.msrb.gmra.mxu1 %vm1253_vm3, %v1216_v0 }
 0x7be   : > { %v1266_v42 = vpop.f32.mrf.mxu1 }
 0x7bf   : > { %v1267_v43 = vadd.f32 %v1620_v41, %v1266_v42 }
 0x7c1   : > { %v1270_v44 = vadd.f32 %v1267_v43, %v2149_v31 }
 0x7c3   : > { %1271 = vst.msk [vmem:[%s618_s16] sm:$0xff] %vm631_vm0, %v1270_v44 }
 0x7c4   : > { %1792 = shalt.err (!%p1789_p9)
}
 0x7c5   : > { %1522 = dma.vmem_to_hbm [thread:$0]  (%p2000_p4), %s1287_s17, 128, %s1289_s25, %s1273_s27  }
 0x7c6   : > { %v1268_v31 = vpop.f32.mrf.mxu1 }
 0x7c7 PF: > { %s2281_s21 = sld [smem:[#allocation23_spill]] }
 0x7c8   : > { %s2282_s30 = sld [smem:[#allocation19_spill]] }
 0x7cd   : > { %p1549_p10 = scmp.ge.s32.totalorder %s2281_s21, 2 }
 0x7ce   : > { %s1300_s20 = sand.u32 1, %s2282_s30  }
 0x7cf   : > { %p1538_p11 = pnand %p1549_p10, %p2007_p8  ;;  %s1301_s19 = scalar_lea.sflag [#allocation8], %s1300_s20 }
 0x7d1   : > { %p1539_p12 = pneg %p1538_p11 }
 0x7d3   : > { %1830 = dma.done.wait (%p1539_p12), %s1301_s19, 128  }
 0x7d4   : > { %1832 = vsyncadd (%p1539_p12), %s1301_s19, 4294967168  ;;  %s33_s29 = sadd.s32 1, %s2281_s21   ;;  %s2284_s24 = sld [smem:[#allocation20_spill]] }
 0x7d5   : > { %p30_p13 = scmp.ge.s32.totalorder %s33_s29, 4   ;;  %s2285_s25 = sld [smem:[#allocation21_spill]] }
 0x7d6   : > { %s2286_s26 = sld [smem:[#allocation27_spill]] }
 0x7d7   : > { %s2287_s27 = sld [smem:[#allocation22_spill]]  ;;  %32 = sbr.rel (!%p30_p13) target bundleno = 15 (0xf), region = 146 }
 0x7d8   : > { %s2288_s28 = sld [smem:[#allocation24_spill]] }
 0x7dc   :  { %1307 = vsyncpa [#allocation7], 1 }
 0x7dd   :  { %1309 = vsyncpa [#allocation7 + $0x1], 1 }
 0x7de   :  { %1310 = vsyncpa [#allocation10], 1 }
 0x7df   :  { %1311 = vsyncpa [#allocation13], 1 }
 0x7e0   :  { %1312 = vsyncpa [#allocation8], 1 }
 0x7e1   :  { %1314 = vsyncpa [#allocation8 + $0x1], 1 }

</bundles_post_ra>
